<compile_context>
chip_gen: v7x
topology: tpu7x:2x2x1
jax: 0.10.0
libtpu: 0.0.40
codegen_flags: <defaults>
</compile_context>

<pallas_src>
import jax
import jax.numpy as jnp
from jax.experimental import pallas as pl
from jax.experimental.pallas import tpu as pltpu

VOCAB = 4      # input_size (vocab for the embedding and output classes)
EMB = 10       # embedding_size
HID = 8        # hidden_size
LAYERS = 2     # num_layers (unrolled statically in the kernel)
BATCH = 1      # batch_size (hardcoded by the module's init_hidden)
SEQ = 8        # sequence length for the example input


def _lstm_kernel(tok_ref,                     # (T, 1)  int32 tokens
                 w0c_ref, b0_ref,             # (V, 4H) fused emb@W_ih0^T, (1, 4H)
                 whh0_ref,                    # (H, 4H) layer-0 recurrent weight
                 wih1_ref, whh1_ref, b1_ref,  # (H, 4H) (H, 4H) (1, 4H) layer 1
                 wout_ref, bout_ref,          # (H, V) (1, V)  final linear
                 out_ref,                     # (T, V)
                 hs_ref):                     # scratch (T, H): per-step h1
    H = HID
    T = SEQ

    # ---- fused embedding lookup + layer-0 input projection for ALL timesteps ----
    tok = tok_ref[...]                                                 # (T, 1) int32
    vocab_iota = jax.lax.broadcasted_iota(jnp.int32, (T, VOCAB), 1)    # (T, V)
    onehot = (vocab_iota == tok).astype(jnp.float32)                   # (T, V)
    g0_all = (jnp.dot(onehot, w0c_ref[...],
                      preferred_element_type=jnp.float32)
              + b0_ref[...])                                           # (T, 4H)

    # ---- weights resident in vregs (loaded once, reused every step) ----
    whh0 = whh0_ref[...]
    wih1 = wih1_ref[...]
    whh1 = whh1_ref[...]
    b1 = b1_ref[...]

    # ---- recurrent state carried as values (vregs), no VMEM round-trips ----
    h0 = jnp.zeros((1, H), jnp.float32)
    c0 = jnp.zeros((1, H), jnp.float32)
    h1 = jnp.zeros((1, H), jnp.float32)
    c1 = jnp.zeros((1, H), jnp.float32)

    # Fully unrolled time loop (T is small and static) for scheduler visibility.
    # PyTorch gate order: i, f, g, o.
    for t in range(T):
        # -- layer 0: only the h-dependent matmul sits on the serial chain --
        g0 = g0_all[t:t + 1, :] + jnp.dot(h0, whh0,
                                          preferred_element_type=jnp.float32)
        s0 = jax.nn.sigmoid(g0)          # full-width: one EUP push
        t0 = jnp.tanh(g0)                # full-width: one EUP push
        c0 = s0[:, 1 * H:2 * H] * c0 + s0[:, 0 * H:1 * H] * t0[:, 2 * H:3 * H]
        h0 = s0[:, 3 * H:4 * H] * jnp.tanh(c0)

        # -- layer 1: the h1-dependent matmul is independent of layer 0 and can
        #    be issued in parallel with it; only h0 @ W_ih1 is serialized. --
        g1 = (jnp.dot(h1, whh1, preferred_element_type=jnp.float32) + b1
              + jnp.dot(h0, wih1, preferred_element_type=jnp.float32))
        s1 = jax.nn.sigmoid(g1)
        t1 = jnp.tanh(g1)
        c1 = s1[:, 1 * H:2 * H] * c1 + s1[:, 0 * H:1 * H] * t1[:, 2 * H:3 * H]
        h1 = s1[:, 3 * H:4 * H] * jnp.tanh(c1)

        hs_ref[pl.ds(t, 1), :] = h1      # static offset; off the critical path

    # ---- batched output projection: one matmul + one store for all timesteps ----
    out_ref[...] = (jnp.dot(hs_ref[...], wout_ref[...],
                            preferred_element_type=jnp.float32)
                    + bout_ref[...])


@jax.jit
def net_forward(tokens, params):
    """tokens: (BATCH, SEQ) int32 in [0, VOCAB). Returns (BATCH, SEQ, VOCAB) f32."""
    emb = params["embedding"].astype(jnp.float32)                 # (V, E)
    # Fuse embedding table with the layer-0 input weight: x@W_ih0^T == onehot@(E@W_ih0^T)
    w0c = jnp.dot(emb, params["w_ih0"].T)                         # (V, 4H)
    b0 = (params["b_ih0"] + params["b_hh0"]).reshape(1, 4 * HID)
    b1 = (params["b_ih1"] + params["b_hh1"]).reshape(1, 4 * HID)

    in_arrays = (
        tokens.reshape(SEQ, 1).astype(jnp.int32),                 # B == 1
        w0c, b0,
        params["w_hh0"].T,
        params["w_ih1"].T, params["w_hh1"].T, b1,
        params["w_out"].T, params["b_out"].reshape(1, VOCAB),
    )

    vmem = pl.BlockSpec(memory_space=pltpu.MemorySpace.VMEM)
    out = pl.pallas_call(
        _lstm_kernel,
        out_shape=jax.ShapeDtypeStruct((SEQ, VOCAB), jnp.float32),
        in_specs=[vmem] * len(in_arrays),
        out_specs=vmem,
        scratch_shapes=[pltpu.VMEM((SEQ, HID), jnp.float32)],
    )(*in_arrays)
    return out.reshape(BATCH, SEQ, VOCAB)


def net_forward_reference(tokens, params):
    """Pure-JAX reference for correctness checking (mirrors PyTorch structure)."""
    emb = params["embedding"][tokens].astype(jnp.float32)  # (B, T, E)
    B, T, _ = emb.shape
    h = [jnp.zeros((B, HID), jnp.float32) for _ in range(LAYERS)]
    c = [jnp.zeros((B, HID), jnp.float32) for _ in range(LAYERS)]
    outs = []
    for t in range(T):
        x = emb[:, t, :]
        for layer in range(LAYERS):
            wih = params[f"w_ih{layer}"]
            whh = params[f"w_hh{layer}"]
            b = params[f"b_ih{layer}"] + params[f"b_hh{layer}"]
            g = x @ wih.T + h[layer] @ whh.T + b
            ig, fg, gg, og = jnp.split(g, 4, axis=-1)
            ig, fg, og = jax.nn.sigmoid(ig), jax.nn.sigmoid(fg), jax.nn.sigmoid(og)
            gg = jnp.tanh(gg)
            c[layer] = fg * c[layer] + ig * gg
            h[layer] = og * jnp.tanh(c[layer])
            x = h[layer]
        outs.append(x @ params["w_out"].T + params["b_out"])
    return jnp.stack(outs, axis=1)


def make_params(key):
    ks = jax.random.split(key, 12)
    u = lambda k, shape, s: jax.random.uniform(k, shape, jnp.float32, -s, s)
    return {
        "embedding": u(ks[0], (VOCAB, EMB), 1.0),
        # layer 0: input dim = EMB
        "w_ih0": u(ks[1], (4 * HID, EMB), 0.35),
        "w_hh0": u(ks[2], (4 * HID, HID), 0.35),
        "b_ih0": u(ks[3], (4 * HID,), 0.35),
        "b_hh0": u(ks[4], (4 * HID,), 0.35),
        # layer 1: input dim = HID
        "w_ih1": u(ks[5], (4 * HID, HID), 0.35),
        "w_hh1": u(ks[6], (4 * HID, HID), 0.35),
        "b_ih1": u(ks[7], (4 * HID,), 0.35),
        "b_hh1": u(ks[8], (4 * HID,), 0.35),
        # final linear: hidden -> vocab
        "w_out": u(ks[9], (VOCAB, HID), 0.35),
        "b_out": u(ks[10], (VOCAB,), 0.35),
    }


if __name__ == "__main__":
    key = jax.random.PRNGKey(0)
    k_tok, k_par = jax.random.split(key)
    tokens = jax.random.randint(k_tok, (BATCH, SEQ), 0, VOCAB, dtype=jnp.int32)
    params = make_params(k_par)

    out = jax.block_until_ready(net_forward(tokens, params))

    ref = net_forward_reference(tokens, params)
    assert out.shape == (BATCH, SEQ, VOCAB)
    assert jnp.allclose(out, ref, atol=2e-5, rtol=2e-5), "mismatch vs JAX reference"
    print("KERNEL_OK")
</pallas_src>

<mosaic_0001>
module attributes {stable_mosaic.version = 11 : i64} {
  func.func @_lstm_kernel(%arg0: memref<8x1xi32, #tpu.memory_space<vmem>>, %arg1: memref<4x32xf32, #tpu.memory_space<vmem>>, %arg2: memref<1x32xf32, #tpu.memory_space<vmem>>, %arg3: memref<8x32xf32, #tpu.memory_space<vmem>>, %arg4: memref<8x32xf32, #tpu.memory_space<vmem>>, %arg5: memref<8x32xf32, #tpu.memory_space<vmem>>, %arg6: memref<1x32xf32, #tpu.memory_space<vmem>>, %arg7: memref<8x4xf32, #tpu.memory_space<vmem>>, %arg8: memref<1x4xf32, #tpu.memory_space<vmem>>, %arg9: memref<8x4xf32, #tpu.memory_space<vmem>>, %arg10: memref<8x8xf32, #tpu.memory_space<vmem>>) attributes {dimension_semantics = [], scalar_prefetch = 0 : i64, scratch_operands = 1 : i64, tpu.core_type = #tpu.core_type<tc>} {
    %c0 = arith.constant 0 : index
    %c0_0 = arith.constant 0 : index
    %0 = vector.load %arg0[%c0, %c0_0] : memref<8x1xi32, #tpu.memory_space<vmem>>, vector<8x1xi32>
    %1 = tpu.iota {dimensions = array<i32: 1>} : vector<8x4xi32>
    %2 = vector.broadcast %0 : vector<8x1xi32> to vector<8x4xi32>
    %3 = arith.cmpi eq, %1, %2 : vector<8x4xi32>
    %4 = arith.extui %3 : vector<8x4xi1> to vector<8x4xi32>
    %5 = arith.sitofp %4 : vector<8x4xi32> to vector<8x4xf32>
    %c0_1 = arith.constant 0 : index
    %c0_2 = arith.constant 0 : index
    %6 = vector.load %arg1[%c0_1, %c0_2] : memref<4x32xf32, #tpu.memory_space<vmem>>, vector<4x32xf32>
    %cst = arith.constant dense<0.000000e+00> : vector<8x32xf32>
    %7 = tpu.matmul %5, %6, %cst {dimension_numbers = #tpu.dot_dimension_numbers<[1], [0], [0], [1], [0, 0, 1, 1], [], []>} : vector<8x4xf32>, vector<4x32xf32>, vector<8x32xf32> -> vector<8x32xf32>
    %c0_3 = arith.constant 0 : index
    %c0_4 = arith.constant 0 : index
    %8 = vector.load %arg2[%c0_3, %c0_4] : memref<1x32xf32, #tpu.memory_space<vmem>>, vector<1x32xf32>
    %9 = vector.broadcast %8 : vector<1x32xf32> to vector<8x32xf32>
    %10 = arith.addf %7, %9 : vector<8x32xf32>
    %c0_5 = arith.constant 0 : index
    %c0_6 = arith.constant 0 : index
    %11 = vector.load %arg3[%c0_5, %c0_6] : memref<8x32xf32, #tpu.memory_space<vmem>>, vector<8x32xf32>
    %c0_7 = arith.constant 0 : index
    %c0_8 = arith.constant 0 : index
    %12 = vector.load %arg4[%c0_7, %c0_8] : memref<8x32xf32, #tpu.memory_space<vmem>>, vector<8x32xf32>
    %c0_9 = arith.constant 0 : index
    %c0_10 = arith.constant 0 : index
    %13 = vector.load %arg5[%c0_9, %c0_10] : memref<8x32xf32, #tpu.memory_space<vmem>>, vector<8x32xf32>
    %c0_11 = arith.constant 0 : index
    %c0_12 = arith.constant 0 : index
    %14 = vector.load %arg6[%c0_11, %c0_12] : memref<1x32xf32, #tpu.memory_space<vmem>>, vector<1x32xf32>
    %cst_13 = arith.constant 0.000000e+00 : f32
    %15 = vector.broadcast %cst_13 : f32 to vector<1x8xf32>
    %cst_14 = arith.constant 0.000000e+00 : f32
    %16 = vector.broadcast %cst_14 : f32 to vector<1x8xf32>
    %cst_15 = arith.constant 0.000000e+00 : f32
    %17 = vector.broadcast %cst_15 : f32 to vector<1x8xf32>
    %cst_16 = arith.constant 0.000000e+00 : f32
    %18 = vector.broadcast %cst_16 : f32 to vector<1x8xf32>
    %19 = vector.extract_strided_slice %10 {offsets = [0, 0], sizes = [1, 32], strides = [1, 1]} : vector<8x32xf32> to vector<1x32xf32>
    %cst_17 = arith.constant dense<0.000000e+00> : vector<1x32xf32>
    %20 = tpu.matmul %15, %11, %cst_17 {dimension_numbers = #tpu.dot_dimension_numbers<[1], [0], [0], [1], [0, 0, 1, 1], [], []>} : vector<1x8xf32>, vector<8x32xf32>, vector<1x32xf32> -> vector<1x32xf32>
    %21 = arith.addf %19, %20 : vector<1x32xf32>
    %22 = arith.negf %21 : vector<1x32xf32>
    %23 = math.exp %22 : vector<1x32xf32>
    %cst_18 = arith.constant 1.000000e+00 : f32
    %24 = vector.broadcast %cst_18 : f32 to vector<1x32xf32>
    %25 = arith.addf %24, %23 : vector<1x32xf32>
    %26 = arith.divf %24, %25 : vector<1x32xf32>
    %27 = math.tanh %21 : vector<1x32xf32>
    %28 = vector.extract_strided_slice %26 {offsets = [0, 8], sizes = [1, 8], strides = [1, 1]} : vector<1x32xf32> to vector<1x8xf32>
    %29 = arith.mulf %28, %16 : vector<1x8xf32>
    %30 = vector.extract_strided_slice %26 {offsets = [0, 0], sizes = [1, 8], strides = [1, 1]} : vector<1x32xf32> to vector<1x8xf32>
    %31 = vector.extract_strided_slice %27 {offsets = [0, 16], sizes = [1, 8], strides = [1, 1]} : vector<1x32xf32> to vector<1x8xf32>
    %32 = arith.mulf %30, %31 : vector<1x8xf32>
    %33 = arith.addf %29, %32 : vector<1x8xf32>
    %34 = vector.extract_strided_slice %26 {offsets = [0, 24], sizes = [1, 8], strides = [1, 1]} : vector<1x32xf32> to vector<1x8xf32>
    %35 = math.tanh %33 : vector<1x8xf32>
    %36 = arith.mulf %34, %35 : vector<1x8xf32>
    %cst_19 = arith.constant dense<0.000000e+00> : vector<1x32xf32>
    %37 = tpu.matmul %17, %13, %cst_19 {dimension_numbers = #tpu.dot_dimension_numbers<[1], [0], [0], [1], [0, 0, 1, 1], [], []>} : vector<1x8xf32>, vector<8x32xf32>, vector<1x32xf32> -> vector<1x32xf32>
    %38 = arith.addf %37, %14 : vector<1x32xf32>
    %cst_20 = arith.constant dense<0.000000e+00> : vector<1x32xf32>
    %39 = tpu.matmul %36, %12, %cst_20 {dimension_numbers = #tpu.dot_dimension_numbers<[1], [0], [0], [1], [0, 0, 1, 1], [], []>} : vector<1x8xf32>, vector<8x32xf32>, vector<1x32xf32> -> vector<1x32xf32>
    %40 = arith.addf %38, %39 : vector<1x32xf32>
    %41 = arith.negf %40 : vector<1x32xf32>
    %42 = math.exp %41 : vector<1x32xf32>
    %cst_21 = arith.constant 1.000000e+00 : f32
    %43 = vector.broadcast %cst_21 : f32 to vector<1x32xf32>
    %44 = arith.addf %43, %42 : vector<1x32xf32>
    %45 = arith.divf %43, %44 : vector<1x32xf32>
    %46 = math.tanh %40 : vector<1x32xf32>
    %47 = vector.extract_strided_slice %45 {offsets = [0, 8], sizes = [1, 8], strides = [1, 1]} : vector<1x32xf32> to vector<1x8xf32>
    %48 = arith.mulf %47, %18 : vector<1x8xf32>
    %49 = vector.extract_strided_slice %45 {offsets = [0, 0], sizes = [1, 8], strides = [1, 1]} : vector<1x32xf32> to vector<1x8xf32>
    %50 = vector.extract_strided_slice %46 {offsets = [0, 16], sizes = [1, 8], strides = [1, 1]} : vector<1x32xf32> to vector<1x8xf32>
    %51 = arith.mulf %49, %50 : vector<1x8xf32>
    %52 = arith.addf %48, %51 : vector<1x8xf32>
    %53 = vector.extract_strided_slice %45 {offsets = [0, 24], sizes = [1, 8], strides = [1, 1]} : vector<1x32xf32> to vector<1x8xf32>
    %54 = math.tanh %52 : vector<1x8xf32>
    %55 = arith.mulf %53, %54 : vector<1x8xf32>
    %c0_22 = arith.constant 0 : index
    %c0_23 = arith.constant 0 : index
    %56 = vector.load %arg10[%c0_22, %c0_23] : memref<8x8xf32, #tpu.memory_space<vmem>>, vector<1x8xf32>
    tpu.vector_store %arg10[%c0_22, %c0_23], %55 {strides = array<i32>} : memref<8x8xf32, #tpu.memory_space<vmem>>, vector<1x8xf32>,
    %57 = vector.extract_strided_slice %10 {offsets = [1, 0], sizes = [1, 32], strides = [1, 1]} : vector<8x32xf32> to vector<1x32xf32>
    %cst_24 = arith.constant dense<0.000000e+00> : vector<1x32xf32>
    %58 = tpu.matmul %36, %11, %cst_24 {dimension_numbers = #tpu.dot_dimension_numbers<[1], [0], [0], [1], [0, 0, 1, 1], [], []>} : vector<1x8xf32>, vector<8x32xf32>, vector<1x32xf32> -> vector<1x32xf32>
    %59 = arith.addf %57, %58 : vector<1x32xf32>
    %60 = arith.negf %59 : vector<1x32xf32>
    %61 = math.exp %60 : vector<1x32xf32>
    %cst_25 = arith.constant 1.000000e+00 : f32
    %62 = vector.broadcast %cst_25 : f32 to vector<1x32xf32>
    %63 = arith.addf %62, %61 : vector<1x32xf32>
    %64 = arith.divf %62, %63 : vector<1x32xf32>
    %65 = math.tanh %59 : vector<1x32xf32>
    %66 = vector.extract_strided_slice %64 {offsets = [0, 8], sizes = [1, 8], strides = [1, 1]} : vector<1x32xf32> to vector<1x8xf32>
    %67 = arith.mulf %66, %33 : vector<1x8xf32>
    %68 = vector.extract_strided_slice %64 {offsets = [0, 0], sizes = [1, 8], strides = [1, 1]} : vector<1x32xf32> to vector<1x8xf32>
    %69 = vector.extract_strided_slice %65 {offsets = [0, 16], sizes = [1, 8], strides = [1, 1]} : vector<1x32xf32> to vector<1x8xf32>
    %70 = arith.mulf %68, %69 : vector<1x8xf32>
    %71 = arith.addf %67, %70 : vector<1x8xf32>
    %72 = vector.extract_strided_slice %64 {offsets = [0, 24], sizes = [1, 8], strides = [1, 1]} : vector<1x32xf32> to vector<1x8xf32>
    %73 = math.tanh %71 : vector<1x8xf32>
    %74 = arith.mulf %72, %73 : vector<1x8xf32>
    %cst_26 = arith.constant dense<0.000000e+00> : vector<1x32xf32>
    %75 = tpu.matmul %55, %13, %cst_26 {dimension_numbers = #tpu.dot_dimension_numbers<[1], [0], [0], [1], [0, 0, 1, 1], [], []>} : vector<1x8xf32>, vector<8x32xf32>, vector<1x32xf32> -> vector<1x32xf32>
    %76 = arith.addf %75, %14 : vector<1x32xf32>
    %cst_27 = arith.constant dense<0.000000e+00> : vector<1x32xf32>
    %77 = tpu.matmul %74, %12, %cst_27 {dimension_numbers = #tpu.dot_dimension_numbers<[1], [0], [0], [1], [0, 0, 1, 1], [], []>} : vector<1x8xf32>, vector<8x32xf32>, vector<1x32xf32> -> vector<1x32xf32>
    %78 = arith.addf %76, %77 : vector<1x32xf32>
    %79 = arith.negf %78 : vector<1x32xf32>
    %80 = math.exp %79 : vector<1x32xf32>
    %cst_28 = arith.constant 1.000000e+00 : f32
    %81 = vector.broadcast %cst_28 : f32 to vector<1x32xf32>
    %82 = arith.addf %81, %80 : vector<1x32xf32>
    %83 = arith.divf %81, %82 : vector<1x32xf32>
    %84 = math.tanh %78 : vector<1x32xf32>
    %85 = vector.extract_strided_slice %83 {offsets = [0, 8], sizes = [1, 8], strides = [1, 1]} : vector<1x32xf32> to vector<1x8xf32>
    %86 = arith.mulf %85, %52 : vector<1x8xf32>
    %87 = vector.extract_strided_slice %83 {offsets = [0, 0], sizes = [1, 8], strides = [1, 1]} : vector<1x32xf32> to vector<1x8xf32>
    %88 = vector.extract_strided_slice %84 {offsets = [0, 16], sizes = [1, 8], strides = [1, 1]} : vector<1x32xf32> to vector<1x8xf32>
    %89 = arith.mulf %87, %88 : vector<1x8xf32>
    %90 = arith.addf %86, %89 : vector<1x8xf32>
    %91 = vector.extract_strided_slice %83 {offsets = [0, 24], sizes = [1, 8], strides = [1, 1]} : vector<1x32xf32> to vector<1x8xf32>
    %92 = math.tanh %90 : vector<1x8xf32>
    %93 = arith.mulf %91, %92 : vector<1x8xf32>
    %c1 = arith.constant 1 : index
    %c0_29 = arith.constant 0 : index
    %94 = vector.load %arg10[%c1, %c0_29] : memref<8x8xf32, #tpu.memory_space<vmem>>, vector<1x8xf32>
    tpu.vector_store %arg10[%c1, %c0_29], %93 {strides = array<i32>} : memref<8x8xf32, #tpu.memory_space<vmem>>, vector<1x8xf32>,
    %95 = vector.extract_strided_slice %10 {offsets = [2, 0], sizes = [1, 32], strides = [1, 1]} : vector<8x32xf32> to vector<1x32xf32>
    %cst_30 = arith.constant dense<0.000000e+00> : vector<1x32xf32>
    %96 = tpu.matmul %74, %11, %cst_30 {dimension_numbers = #tpu.dot_dimension_numbers<[1], [0], [0], [1], [0, 0, 1, 1], [], []>} : vector<1x8xf32>, vector<8x32xf32>, vector<1x32xf32> -> vector<1x32xf32>
    %97 = arith.addf %95, %96 : vector<1x32xf32>
    %98 = arith.negf %97 : vector<1x32xf32>
    %99 = math.exp %98 : vector<1x32xf32>
    %cst_31 = arith.constant 1.000000e+00 : f32
    %100 = vector.broadcast %cst_31 : f32 to vector<1x32xf32>
    %101 = arith.addf %100, %99 : vector<1x32xf32>
    %102 = arith.divf %100, %101 : vector<1x32xf32>
    %103 = math.tanh %97 : vector<1x32xf32>
    %104 = vector.extract_strided_slice %102 {offsets = [0, 8], sizes = [1, 8], strides = [1, 1]} : vector<1x32xf32> to vector<1x8xf32>
    %105 = arith.mulf %104, %71 : vector<1x8xf32>
    %106 = vector.extract_strided_slice %102 {offsets = [0, 0], sizes = [1, 8], strides = [1, 1]} : vector<1x32xf32> to vector<1x8xf32>
    %107 = vector.extract_strided_slice %103 {offsets = [0, 16], sizes = [1, 8], strides = [1, 1]} : vector<1x32xf32> to vector<1x8xf32>
    %108 = arith.mulf %106, %107 : vector<1x8xf32>
    %109 = arith.addf %105, %108 : vector<1x8xf32>
    %110 = vector.extract_strided_slice %102 {offsets = [0, 24], sizes = [1, 8], strides = [1, 1]} : vector<1x32xf32> to vector<1x8xf32>
    %111 = math.tanh %109 : vector<1x8xf32>
    %112 = arith.mulf %110, %111 : vector<1x8xf32>
    %cst_32 = arith.constant dense<0.000000e+00> : vector<1x32xf32>
    %113 = tpu.matmul %93, %13, %cst_32 {dimension_numbers = #tpu.dot_dimension_numbers<[1], [0], [0], [1], [0, 0, 1, 1], [], []>} : vector<1x8xf32>, vector<8x32xf32>, vector<1x32xf32> -> vector<1x32xf32>
    %114 = arith.addf %113, %14 : vector<1x32xf32>
    %cst_33 = arith.constant dense<0.000000e+00> : vector<1x32xf32>
    %115 = tpu.matmul %112, %12, %cst_33 {dimension_numbers = #tpu.dot_dimension_numbers<[1], [0], [0], [1], [0, 0, 1, 1], [], []>} : vector<1x8xf32>, vector<8x32xf32>, vector<1x32xf32> -> vector<1x32xf32>
    %116 = arith.addf %114, %115 : vector<1x32xf32>
    %117 = arith.negf %116 : vector<1x32xf32>
    %118 = math.exp %117 : vector<1x32xf32>
    %cst_34 = arith.constant 1.000000e+00 : f32
    %119 = vector.broadcast %cst_34 : f32 to vector<1x32xf32>
    %120 = arith.addf %119, %118 : vector<1x32xf32>
    %121 = arith.divf %119, %120 : vector<1x32xf32>
    %122 = math.tanh %116 : vector<1x32xf32>
    %123 = vector.extract_strided_slice %121 {offsets = [0, 8], sizes = [1, 8], strides = [1, 1]} : vector<1x32xf32> to vector<1x8xf32>
    %124 = arith.mulf %123, %90 : vector<1x8xf32>
    %125 = vector.extract_strided_slice %121 {offsets = [0, 0], sizes = [1, 8], strides = [1, 1]} : vector<1x32xf32> to vector<1x8xf32>
    %126 = vector.extract_strided_slice %122 {offsets = [0, 16], sizes = [1, 8], strides = [1, 1]} : vector<1x32xf32> to vector<1x8xf32>
    %127 = arith.mulf %125, %126 : vector<1x8xf32>
    %128 = arith.addf %124, %127 : vector<1x8xf32>
    %129 = vector.extract_strided_slice %121 {offsets = [0, 24], sizes = [1, 8], strides = [1, 1]} : vector<1x32xf32> to vector<1x8xf32>
    %130 = math.tanh %128 : vector<1x8xf32>
    %131 = arith.mulf %129, %130 : vector<1x8xf32>
    %c2 = arith.constant 2 : index
    %c0_35 = arith.constant 0 : index
    %132 = vector.load %arg10[%c2, %c0_35] : memref<8x8xf32, #tpu.memory_space<vmem>>, vector<1x8xf32>
    tpu.vector_store %arg10[%c2, %c0_35], %131 {strides = array<i32>} : memref<8x8xf32, #tpu.memory_space<vmem>>, vector<1x8xf32>,
    %133 = vector.extract_strided_slice %10 {offsets = [3, 0], sizes = [1, 32], strides = [1, 1]} : vector<8x32xf32> to vector<1x32xf32>
    %cst_36 = arith.constant dense<0.000000e+00> : vector<1x32xf32>
    %134 = tpu.matmul %112, %11, %cst_36 {dimension_numbers = #tpu.dot_dimension_numbers<[1], [0], [0], [1], [0, 0, 1, 1], [], []>} : vector<1x8xf32>, vector<8x32xf32>, vector<1x32xf32> -> vector<1x32xf32>
    %135 = arith.addf %133, %134 : vector<1x32xf32>
    %136 = arith.negf %135 : vector<1x32xf32>
    %137 = math.exp %136 : vector<1x32xf32>
    %cst_37 = arith.constant 1.000000e+00 : f32
    %138 = vector.broadcast %cst_37 : f32 to vector<1x32xf32>
    %139 = arith.addf %138, %137 : vector<1x32xf32>
    %140 = arith.divf %138, %139 : vector<1x32xf32>
    %141 = math.tanh %135 : vector<1x32xf32>
    %142 = vector.extract_strided_slice %140 {offsets = [0, 8], sizes = [1, 8], strides = [1, 1]} : vector<1x32xf32> to vector<1x8xf32>
    %143 = arith.mulf %142, %109 : vector<1x8xf32>
    %144 = vector.extract_strided_slice %140 {offsets = [0, 0], sizes = [1, 8], strides = [1, 1]} : vector<1x32xf32> to vector<1x8xf32>
    %145 = vector.extract_strided_slice %141 {offsets = [0, 16], sizes = [1, 8], strides = [1, 1]} : vector<1x32xf32> to vector<1x8xf32>
    %146 = arith.mulf %144, %145 : vector<1x8xf32>
    %147 = arith.addf %143, %146 : vector<1x8xf32>
    %148 = vector.extract_strided_slice %140 {offsets = [0, 24], sizes = [1, 8], strides = [1, 1]} : vector<1x32xf32> to vector<1x8xf32>
    %149 = math.tanh %147 : vector<1x8xf32>
    %150 = arith.mulf %148, %149 : vector<1x8xf32>
    %cst_38 = arith.constant dense<0.000000e+00> : vector<1x32xf32>
    %151 = tpu.matmul %131, %13, %cst_38 {dimension_numbers = #tpu.dot_dimension_numbers<[1], [0], [0], [1], [0, 0, 1, 1], [], []>} : vector<1x8xf32>, vector<8x32xf32>, vector<1x32xf32> -> vector<1x32xf32>
    %152 = arith.addf %151, %14 : vector<1x32xf32>
    %cst_39 = arith.constant dense<0.000000e+00> : vector<1x32xf32>
    %153 = tpu.matmul %150, %12, %cst_39 {dimension_numbers = #tpu.dot_dimension_numbers<[1], [0], [0], [1], [0, 0, 1, 1], [], []>} : vector<1x8xf32>, vector<8x32xf32>, vector<1x32xf32> -> vector<1x32xf32>
    %154 = arith.addf %152, %153 : vector<1x32xf32>
    %155 = arith.negf %154 : vector<1x32xf32>
    %156 = math.exp %155 : vector<1x32xf32>
    %cst_40 = arith.constant 1.000000e+00 : f32
    %157 = vector.broadcast %cst_40 : f32 to vector<1x32xf32>
    %158 = arith.addf %157, %156 : vector<1x32xf32>
    %159 = arith.divf %157, %158 : vector<1x32xf32>
    %160 = math.tanh %154 : vector<1x32xf32>
    %161 = vector.extract_strided_slice %159 {offsets = [0, 8], sizes = [1, 8], strides = [1, 1]} : vector<1x32xf32> to vector<1x8xf32>
    %162 = arith.mulf %161, %128 : vector<1x8xf32>
    %163 = vector.extract_strided_slice %159 {offsets = [0, 0], sizes = [1, 8], strides = [1, 1]} : vector<1x32xf32> to vector<1x8xf32>
    %164 = vector.extract_strided_slice %160 {offsets = [0, 16], sizes = [1, 8], strides = [1, 1]} : vector<1x32xf32> to vector<1x8xf32>
    %165 = arith.mulf %163, %164 : vector<1x8xf32>
    %166 = arith.addf %162, %165 : vector<1x8xf32>
    %167 = vector.extract_strided_slice %159 {offsets = [0, 24], sizes = [1, 8], strides = [1, 1]} : vector<1x32xf32> to vector<1x8xf32>
    %168 = math.tanh %166 : vector<1x8xf32>
    %169 = arith.mulf %167, %168 : vector<1x8xf32>
    %c3 = arith.constant 3 : index
    %c0_41 = arith.constant 0 : index
    %170 = vector.load %arg10[%c3, %c0_41] : memref<8x8xf32, #tpu.memory_space<vmem>>, vector<1x8xf32>
    tpu.vector_store %arg10[%c3, %c0_41], %169 {strides = array<i32>} : memref<8x8xf32, #tpu.memory_space<vmem>>, vector<1x8xf32>,
    %171 = vector.extract_strided_slice %10 {offsets = [4, 0], sizes = [1, 32], strides = [1, 1]} : vector<8x32xf32> to vector<1x32xf32>
    %cst_42 = arith.constant dense<0.000000e+00> : vector<1x32xf32>
    %172 = tpu.matmul %150, %11, %cst_42 {dimension_numbers = #tpu.dot_dimension_numbers<[1], [0], [0], [1], [0, 0, 1, 1], [], []>} : vector<1x8xf32>, vector<8x32xf32>, vector<1x32xf32> -> vector<1x32xf32>
    %173 = arith.addf %171, %172 : vector<1x32xf32>
    %174 = arith.negf %173 : vector<1x32xf32>
    %175 = math.exp %174 : vector<1x32xf32>
    %cst_43 = arith.constant 1.000000e+00 : f32
    %176 = vector.broadcast %cst_43 : f32 to vector<1x32xf32>
    %177 = arith.addf %176, %175 : vector<1x32xf32>
    %178 = arith.divf %176, %177 : vector<1x32xf32>
    %179 = math.tanh %173 : vector<1x32xf32>
    %180 = vector.extract_strided_slice %178 {offsets = [0, 8], sizes = [1, 8], strides = [1, 1]} : vector<1x32xf32> to vector<1x8xf32>
    %181 = arith.mulf %180, %147 : vector<1x8xf32>
    %182 = vector.extract_strided_slice %178 {offsets = [0, 0], sizes = [1, 8], strides = [1, 1]} : vector<1x32xf32> to vector<1x8xf32>
    %183 = vector.extract_strided_slice %179 {offsets = [0, 16], sizes = [1, 8], strides = [1, 1]} : vector<1x32xf32> to vector<1x8xf32>
    %184 = arith.mulf %182, %183 : vector<1x8xf32>
    %185 = arith.addf %181, %184 : vector<1x8xf32>
    %186 = vector.extract_strided_slice %178 {offsets = [0, 24], sizes = [1, 8], strides = [1, 1]} : vector<1x32xf32> to vector<1x8xf32>
    %187 = math.tanh %185 : vector<1x8xf32>
    %188 = arith.mulf %186, %187 : vector<1x8xf32>
    %cst_44 = arith.constant dense<0.000000e+00> : vector<1x32xf32>
    %189 = tpu.matmul %169, %13, %cst_44 {dimension_numbers = #tpu.dot_dimension_numbers<[1], [0], [0], [1], [0, 0, 1, 1], [], []>} : vector<1x8xf32>, vector<8x32xf32>, vector<1x32xf32> -> vector<1x32xf32>
    %190 = arith.addf %189, %14 : vector<1x32xf32>
    %cst_45 = arith.constant dense<0.000000e+00> : vector<1x32xf32>
    %191 = tpu.matmul %188, %12, %cst_45 {dimension_numbers = #tpu.dot_dimension_numbers<[1], [0], [0], [1], [0, 0, 1, 1], [], []>} : vector<1x8xf32>, vector<8x32xf32>, vector<1x32xf32> -> vector<1x32xf32>
    %192 = arith.addf %190, %191 : vector<1x32xf32>
    %193 = arith.negf %192 : vector<1x32xf32>
    %194 = math.exp %193 : vector<1x32xf32>
    %cst_46 = arith.constant 1.000000e+00 : f32
    %195 = vector.broadcast %cst_46 : f32 to vector<1x32xf32>
    %196 = arith.addf %195, %194 : vector<1x32xf32>
    %197 = arith.divf %195, %196 : vector<1x32xf32>
    %198 = math.tanh %192 : vector<1x32xf32>
    %199 = vector.extract_strided_slice %197 {offsets = [0, 8], sizes = [1, 8], strides = [1, 1]} : vector<1x32xf32> to vector<1x8xf32>
    %200 = arith.mulf %199, %166 : vector<1x8xf32>
    %201 = vector.extract_strided_slice %197 {offsets = [0, 0], sizes = [1, 8], strides = [1, 1]} : vector<1x32xf32> to vector<1x8xf32>
    %202 = vector.extract_strided_slice %198 {offsets = [0, 16], sizes = [1, 8], strides = [1, 1]} : vector<1x32xf32> to vector<1x8xf32>
    %203 = arith.mulf %201, %202 : vector<1x8xf32>
    %204 = arith.addf %200, %203 : vector<1x8xf32>
    %205 = vector.extract_strided_slice %197 {offsets = [0, 24], sizes = [1, 8], strides = [1, 1]} : vector<1x32xf32> to vector<1x8xf32>
    %206 = math.tanh %204 : vector<1x8xf32>
    %207 = arith.mulf %205, %206 : vector<1x8xf32>
    %c4 = arith.constant 4 : index
    %c0_47 = arith.constant 0 : index
    %208 = vector.load %arg10[%c4, %c0_47] : memref<8x8xf32, #tpu.memory_space<vmem>>, vector<1x8xf32>
    tpu.vector_store %arg10[%c4, %c0_47], %207 {strides = array<i32>} : memref<8x8xf32, #tpu.memory_space<vmem>>, vector<1x8xf32>,
    %209 = vector.extract_strided_slice %10 {offsets = [5, 0], sizes = [1, 32], strides = [1, 1]} : vector<8x32xf32> to vector<1x32xf32>
    %cst_48 = arith.constant dense<0.000000e+00> : vector<1x32xf32>
    %210 = tpu.matmul %188, %11, %cst_48 {dimension_numbers = #tpu.dot_dimension_numbers<[1], [0], [0], [1], [0, 0, 1, 1], [], []>} : vector<1x8xf32>, vector<8x32xf32>, vector<1x32xf32> -> vector<1x32xf32>
    %211 = arith.addf %209, %210 : vector<1x32xf32>
    %212 = arith.negf %211 : vector<1x32xf32>
    %213 = math.exp %212 : vector<1x32xf32>
    %cst_49 = arith.constant 1.000000e+00 : f32
    %214 = vector.broadcast %cst_49 : f32 to vector<1x32xf32>
    %215 = arith.addf %214, %213 : vector<1x32xf32>
    %216 = arith.divf %214, %215 : vector<1x32xf32>
    %217 = math.tanh %211 : vector<1x32xf32>
    %218 = vector.extract_strided_slice %216 {offsets = [0, 8], sizes = [1, 8], strides = [1, 1]} : vector<1x32xf32> to vector<1x8xf32>
    %219 = arith.mulf %218, %185 : vector<1x8xf32>
    %220 = vector.extract_strided_slice %216 {offsets = [0, 0], sizes = [1, 8], strides = [1, 1]} : vector<1x32xf32> to vector<1x8xf32>
    %221 = vector.extract_strided_slice %217 {offsets = [0, 16], sizes = [1, 8], strides = [1, 1]} : vector<1x32xf32> to vector<1x8xf32>
    %222 = arith.mulf %220, %221 : vector<1x8xf32>
    %223 = arith.addf %219, %222 : vector<1x8xf32>
    %224 = vector.extract_strided_slice %216 {offsets = [0, 24], sizes = [1, 8], strides = [1, 1]} : vector<1x32xf32> to vector<1x8xf32>
    %225 = math.tanh %223 : vector<1x8xf32>
    %226 = arith.mulf %224, %225 : vector<1x8xf32>
    %cst_50 = arith.constant dense<0.000000e+00> : vector<1x32xf32>
    %227 = tpu.matmul %207, %13, %cst_50 {dimension_numbers = #tpu.dot_dimension_numbers<[1], [0], [0], [1], [0, 0, 1, 1], [], []>} : vector<1x8xf32>, vector<8x32xf32>, vector<1x32xf32> -> vector<1x32xf32>
    %228 = arith.addf %227, %14 : vector<1x32xf32>
    %cst_51 = arith.constant dense<0.000000e+00> : vector<1x32xf32>
    %229 = tpu.matmul %226, %12, %cst_51 {dimension_numbers = #tpu.dot_dimension_numbers<[1], [0], [0], [1], [0, 0, 1, 1], [], []>} : vector<1x8xf32>, vector<8x32xf32>, vector<1x32xf32> -> vector<1x32xf32>
    %230 = arith.addf %228, %229 : vector<1x32xf32>
    %231 = arith.negf %230 : vector<1x32xf32>
    %232 = math.exp %231 : vector<1x32xf32>
    %cst_52 = arith.constant 1.000000e+00 : f32
    %233 = vector.broadcast %cst_52 : f32 to vector<1x32xf32>
    %234 = arith.addf %233, %232 : vector<1x32xf32>
    %235 = arith.divf %233, %234 : vector<1x32xf32>
    %236 = math.tanh %230 : vector<1x32xf32>
    %237 = vector.extract_strided_slice %235 {offsets = [0, 8], sizes = [1, 8], strides = [1, 1]} : vector<1x32xf32> to vector<1x8xf32>
    %238 = arith.mulf %237, %204 : vector<1x8xf32>
    %239 = vector.extract_strided_slice %235 {offsets = [0, 0], sizes = [1, 8], strides = [1, 1]} : vector<1x32xf32> to vector<1x8xf32>
    %240 = vector.extract_strided_slice %236 {offsets = [0, 16], sizes = [1, 8], strides = [1, 1]} : vector<1x32xf32> to vector<1x8xf32>
    %241 = arith.mulf %239, %240 : vector<1x8xf32>
    %242 = arith.addf %238, %241 : vector<1x8xf32>
    %243 = vector.extract_strided_slice %235 {offsets = [0, 24], sizes = [1, 8], strides = [1, 1]} : vector<1x32xf32> to vector<1x8xf32>
    %244 = math.tanh %242 : vector<1x8xf32>
    %245 = arith.mulf %243, %244 : vector<1x8xf32>
    %c5 = arith.constant 5 : index
    %c0_53 = arith.constant 0 : index
    %246 = vector.load %arg10[%c5, %c0_53] : memref<8x8xf32, #tpu.memory_space<vmem>>, vector<1x8xf32>
    tpu.vector_store %arg10[%c5, %c0_53], %245 {strides = array<i32>} : memref<8x8xf32, #tpu.memory_space<vmem>>, vector<1x8xf32>,
    %247 = vector.extract_strided_slice %10 {offsets = [6, 0], sizes = [1, 32], strides = [1, 1]} : vector<8x32xf32> to vector<1x32xf32>
    %cst_54 = arith.constant dense<0.000000e+00> : vector<1x32xf32>
    %248 = tpu.matmul %226, %11, %cst_54 {dimension_numbers = #tpu.dot_dimension_numbers<[1], [0], [0], [1], [0, 0, 1, 1], [], []>} : vector<1x8xf32>, vector<8x32xf32>, vector<1x32xf32> -> vector<1x32xf32>
    %249 = arith.addf %247, %248 : vector<1x32xf32>
    %250 = arith.negf %249 : vector<1x32xf32>
    %251 = math.exp %250 : vector<1x32xf32>
    %cst_55 = arith.constant 1.000000e+00 : f32
    %252 = vector.broadcast %cst_55 : f32 to vector<1x32xf32>
    %253 = arith.addf %252, %251 : vector<1x32xf32>
    %254 = arith.divf %252, %253 : vector<1x32xf32>
    %255 = math.tanh %249 : vector<1x32xf32>
    %256 = vector.extract_strided_slice %254 {offsets = [0, 8], sizes = [1, 8], strides = [1, 1]} : vector<1x32xf32> to vector<1x8xf32>
    %257 = arith.mulf %256, %223 : vector<1x8xf32>
    %258 = vector.extract_strided_slice %254 {offsets = [0, 0], sizes = [1, 8], strides = [1, 1]} : vector<1x32xf32> to vector<1x8xf32>
    %259 = vector.extract_strided_slice %255 {offsets = [0, 16], sizes = [1, 8], strides = [1, 1]} : vector<1x32xf32> to vector<1x8xf32>
    %260 = arith.mulf %258, %259 : vector<1x8xf32>
    %261 = arith.addf %257, %260 : vector<1x8xf32>
    %262 = vector.extract_strided_slice %254 {offsets = [0, 24], sizes = [1, 8], strides = [1, 1]} : vector<1x32xf32> to vector<1x8xf32>
    %263 = math.tanh %261 : vector<1x8xf32>
    %264 = arith.mulf %262, %263 : vector<1x8xf32>
    %cst_56 = arith.constant dense<0.000000e+00> : vector<1x32xf32>
    %265 = tpu.matmul %245, %13, %cst_56 {dimension_numbers = #tpu.dot_dimension_numbers<[1], [0], [0], [1], [0, 0, 1, 1], [], []>} : vector<1x8xf32>, vector<8x32xf32>, vector<1x32xf32> -> vector<1x32xf32>
    %266 = arith.addf %265, %14 : vector<1x32xf32>
    %cst_57 = arith.constant dense<0.000000e+00> : vector<1x32xf32>
    %267 = tpu.matmul %264, %12, %cst_57 {dimension_numbers = #tpu.dot_dimension_numbers<[1], [0], [0], [1], [0, 0, 1, 1], [], []>} : vector<1x8xf32>, vector<8x32xf32>, vector<1x32xf32> -> vector<1x32xf32>
    %268 = arith.addf %266, %267 : vector<1x32xf32>
    %269 = arith.negf %268 : vector<1x32xf32>
    %270 = math.exp %269 : vector<1x32xf32>
    %cst_58 = arith.constant 1.000000e+00 : f32
    %271 = vector.broadcast %cst_58 : f32 to vector<1x32xf32>
    %272 = arith.addf %271, %270 : vector<1x32xf32>
    %273 = arith.divf %271, %272 : vector<1x32xf32>
    %274 = math.tanh %268 : vector<1x32xf32>
    %275 = vector.extract_strided_slice %273 {offsets = [0, 8], sizes = [1, 8], strides = [1, 1]} : vector<1x32xf32> to vector<1x8xf32>
    %276 = arith.mulf %275, %242 : vector<1x8xf32>
    %277 = vector.extract_strided_slice %273 {offsets = [0, 0], sizes = [1, 8], strides = [1, 1]} : vector<1x32xf32> to vector<1x8xf32>
    %278 = vector.extract_strided_slice %274 {offsets = [0, 16], sizes = [1, 8], strides = [1, 1]} : vector<1x32xf32> to vector<1x8xf32>
    %279 = arith.mulf %277, %278 : vector<1x8xf32>
    %280 = arith.addf %276, %279 : vector<1x8xf32>
    %281 = vector.extract_strided_slice %273 {offsets = [0, 24], sizes = [1, 8], strides = [1, 1]} : vector<1x32xf32> to vector<1x8xf32>
    %282 = math.tanh %280 : vector<1x8xf32>
    %283 = arith.mulf %281, %282 : vector<1x8xf32>
    %c6 = arith.constant 6 : index
    %c0_59 = arith.constant 0 : index
    %284 = vector.load %arg10[%c6, %c0_59] : memref<8x8xf32, #tpu.memory_space<vmem>>, vector<1x8xf32>
    tpu.vector_store %arg10[%c6, %c0_59], %283 {strides = array<i32>} : memref<8x8xf32, #tpu.memory_space<vmem>>, vector<1x8xf32>,
    %285 = vector.extract_strided_slice %10 {offsets = [7, 0], sizes = [1, 32], strides = [1, 1]} : vector<8x32xf32> to vector<1x32xf32>
    %cst_60 = arith.constant dense<0.000000e+00> : vector<1x32xf32>
    %286 = tpu.matmul %264, %11, %cst_60 {dimension_numbers = #tpu.dot_dimension_numbers<[1], [0], [0], [1], [0, 0, 1, 1], [], []>} : vector<1x8xf32>, vector<8x32xf32>, vector<1x32xf32> -> vector<1x32xf32>
    %287 = arith.addf %285, %286 : vector<1x32xf32>
    %288 = arith.negf %287 : vector<1x32xf32>
    %289 = math.exp %288 : vector<1x32xf32>
    %cst_61 = arith.constant 1.000000e+00 : f32
    %290 = vector.broadcast %cst_61 : f32 to vector<1x32xf32>
    %291 = arith.addf %290, %289 : vector<1x32xf32>
    %292 = arith.divf %290, %291 : vector<1x32xf32>
    %293 = math.tanh %287 : vector<1x32xf32>
    %294 = vector.extract_strided_slice %292 {offsets = [0, 8], sizes = [1, 8], strides = [1, 1]} : vector<1x32xf32> to vector<1x8xf32>
    %295 = arith.mulf %294, %261 : vector<1x8xf32>
    %296 = vector.extract_strided_slice %292 {offsets = [0, 0], sizes = [1, 8], strides = [1, 1]} : vector<1x32xf32> to vector<1x8xf32>
    %297 = vector.extract_strided_slice %293 {offsets = [0, 16], sizes = [1, 8], strides = [1, 1]} : vector<1x32xf32> to vector<1x8xf32>
    %298 = arith.mulf %296, %297 : vector<1x8xf32>
    %299 = arith.addf %295, %298 : vector<1x8xf32>
    %300 = vector.extract_strided_slice %292 {offsets = [0, 24], sizes = [1, 8], strides = [1, 1]} : vector<1x32xf32> to vector<1x8xf32>
    %301 = math.tanh %299 : vector<1x8xf32>
    %302 = arith.mulf %300, %301 : vector<1x8xf32>
    %cst_62 = arith.constant dense<0.000000e+00> : vector<1x32xf32>
    %303 = tpu.matmul %283, %13, %cst_62 {dimension_numbers = #tpu.dot_dimension_numbers<[1], [0], [0], [1], [0, 0, 1, 1], [], []>} : vector<1x8xf32>, vector<8x32xf32>, vector<1x32xf32> -> vector<1x32xf32>
    %304 = arith.addf %303, %14 : vector<1x32xf32>
    %cst_63 = arith.constant dense<0.000000e+00> : vector<1x32xf32>
    %305 = tpu.matmul %302, %12, %cst_63 {dimension_numbers = #tpu.dot_dimension_numbers<[1], [0], [0], [1], [0, 0, 1, 1], [], []>} : vector<1x8xf32>, vector<8x32xf32>, vector<1x32xf32> -> vector<1x32xf32>
    %306 = arith.addf %304, %305 : vector<1x32xf32>
    %307 = arith.negf %306 : vector<1x32xf32>
    %308 = math.exp %307 : vector<1x32xf32>
    %cst_64 = arith.constant 1.000000e+00 : f32
    %309 = vector.broadcast %cst_64 : f32 to vector<1x32xf32>
    %310 = arith.addf %309, %308 : vector<1x32xf32>
    %311 = arith.divf %309, %310 : vector<1x32xf32>
    %312 = math.tanh %306 : vector<1x32xf32>
    %313 = vector.extract_strided_slice %311 {offsets = [0, 8], sizes = [1, 8], strides = [1, 1]} : vector<1x32xf32> to vector<1x8xf32>
    %314 = arith.mulf %313, %280 : vector<1x8xf32>
    %315 = vector.extract_strided_slice %311 {offsets = [0, 0], sizes = [1, 8], strides = [1, 1]} : vector<1x32xf32> to vector<1x8xf32>
    %316 = vector.extract_strided_slice %312 {offsets = [0, 16], sizes = [1, 8], strides = [1, 1]} : vector<1x32xf32> to vector<1x8xf32>
    %317 = arith.mulf %315, %316 : vector<1x8xf32>
    %318 = arith.addf %314, %317 : vector<1x8xf32>
    %319 = vector.extract_strided_slice %311 {offsets = [0, 24], sizes = [1, 8], strides = [1, 1]} : vector<1x32xf32> to vector<1x8xf32>
    %320 = math.tanh %318 : vector<1x8xf32>
    %321 = arith.mulf %319, %320 : vector<1x8xf32>
    %c7 = arith.constant 7 : index
    %c0_65 = arith.constant 0 : index
    %322 = vector.load %arg10[%c7, %c0_65] : memref<8x8xf32, #tpu.memory_space<vmem>>, vector<1x8xf32>
    tpu.vector_store %arg10[%c7, %c0_65], %321 {strides = array<i32>} : memref<8x8xf32, #tpu.memory_space<vmem>>, vector<1x8xf32>,
    %c0_66 = arith.constant 0 : index
    %c0_67 = arith.constant 0 : index
    %323 = vector.load %arg10[%c0_66, %c0_67] : memref<8x8xf32, #tpu.memory_space<vmem>>, vector<8x8xf32>
    %c0_68 = arith.constant 0 : index
    %c0_69 = arith.constant 0 : index
    %324 = vector.load %arg7[%c0_68, %c0_69] : memref<8x4xf32, #tpu.memory_space<vmem>>, vector<8x4xf32>
    %cst_70 = arith.constant dense<0.000000e+00> : vector<8x4xf32>
    %325 = tpu.matmul %323, %324, %cst_70 {dimension_numbers = #tpu.dot_dimension_numbers<[1], [0], [0], [1], [0, 0, 1, 1], [], []>} : vector<8x8xf32>, vector<8x4xf32>, vector<8x4xf32> -> vector<8x4xf32>
    %c0_71 = arith.constant 0 : index
    %c0_72 = arith.constant 0 : index
    %326 = vector.load %arg8[%c0_71, %c0_72] : memref<1x4xf32, #tpu.memory_space<vmem>>, vector<1x4xf32>
    %327 = vector.broadcast %326 : vector<1x4xf32> to vector<8x4xf32>
    %328 = arith.addf %325, %327 : vector<8x4xf32>
    %c0_73 = arith.constant 0 : index
    %c0_74 = arith.constant 0 : index
    %329 = vector.load %arg9[%c0_73, %c0_74] : memref<8x4xf32, #tpu.memory_space<vmem>>, vector<8x4xf32>
    tpu.vector_store %arg9[%c0_73, %c0_74], %328 {strides = array<i32>} : memref<8x4xf32, #tpu.memory_space<vmem>>, vector<8x4xf32>,
    return
  }
}

</mosaic_0001>

<bundles_post_ra>
// kernel: net_forward.1
= control target key start
LH: loop header
LB: loop body
LE: loop exit
PB: predicated region body
PF: predicated region fallthrough
CT: control target
= control target key end

     0   :  { %v2832_v0 = vmov 0   ;;  %v2833_v2 = vmov 0.0   ;;  %vm53_vm0 = vcmask 1043456   ;;  %vm2834_vm1 = vmmov 0   ;;  %s3191_s0 = inlined_call_operand.vmem [shape: s32[8,1], index: 0, kind: input, shape index: {}]   ;;  %s3192_s1 = inlined_call_operand.vmem [shape: f32[4,32], index: 1, kind: input, shape index: {}]   ;;  %s3193_s3 = inlined_call_operand.vmem [shape: f32[8,32], index: 3, kind: input, shape index: {}]   ;;  %s3194_s2 = inlined_call_operand.vmem [shape: f32[1,32], index: 2, kind: input, shape index: {}]   ;;  %s3195_s5 = inlined_call_operand.vmem [shape: f32[8,32], index: 5, kind: input, shape index: {}]   ;;  %s3196_s4 = inlined_call_operand.vmem [shape: f32[8,32], index: 4, kind: input, shape index: {}]   ;;  %s3197_s6 = inlined_call_operand.vmem [shape: f32[1,32], index: 6, kind: input, shape index: {}]   ;;  %s3198_s7 = inlined_call_operand.vmem [shape: f32[8,4], index: 7, kind: input, shape index: {}]   ;;  %s3199_s8 = inlined_call_operand.vmem [shape: f32[1,4], index: 8, kind: input, shape index: {}]   ;;  %s3200_s9 = inlined_call_operand.vmem [shape: f32[8,4], index: 9, kind: output, shape index: {}]  }
   0x1   :  { %2703 = vset.pattern.permute.xlu0 %v2832_v0  ;;  %v32_v1 = vld [vmem:[%s3191_s0] sm:$0xff]  ;;  %2542 = vmatprep.subr.mxu0 %v2833_v2  ;;  %v33_v5 = vlaneseq  ;;  %vm49_vm2 = vcmask 31744   ;;  %vm131_vm4 = vcmask 64512   ;;  %vm404_vm5 = vcmask 57344  }
   0x2   :  { %36 = vperm.xlu0 %2703, %v32_v1   ;;  %v41_v3 = vld [vmem:[%s3192_s1] sm:$0xf]  ;;  %2547 = vmatprep.subr.mxu1 %v2833_v2 }
   0x3   :  { %2543 = vmatpush3.msk.msra.mxu0 %vm53_vm0, %v41_v3  ;;  %2544 = vmatprep.mubr.msk.f32.mxu0 %vm2834_vm1, %v2833_v2  ;;  %v2902_v4 = vld [vmem:[%s3193_s3] sm:$0xff]  ;;  %v34_v6 = vand.u32 127, %v33_v5  ;;  %s2835_s3 = smov 112  }
   0x4   :  { %2548 = vmatpush3.msra.mxu1 %v2902_v4  ;;  %2549 = vmatprep.mubr.msk.f32.mxu1 %vm2834_vm1, %v2833_v2  ;;  %v2447_v11 = vld [vmem:[%s3194_s2] ss:$0 sm:$0xff]  ;;  %s2836_s2 = smov 8  }
   0x5   :  { %2550 = vmatmul.mubr.f32.vlgmr.msra.gmra.mrb[0].mxu1 %v2833_v2  ;;  %2552 = vmatprep.subr.mxu0 %v2833_v2  ;;  %v2932_v26 = vld [vmem:[%s3195_s5] sm:$0xff]  ;;  %s2837_s5 = smov 16  }
   0x6   :  { %2562 = vmatprep.subr.mxu1 %v2833_v2  ;;  %2564 = vmatprep.mubr.msk.f32.mxu1 %vm2834_vm1, %v2833_v2  ;;  %v2937_v27 = vld [vmem:[%s3196_s4] sm:$0xff]  ;;  %s2838_s4 = smov 104  }
   0x7   :  { %2563 = vmatpush3.msra.mxu1 %v2902_v4  ;;  %v2961_v32 = vld [vmem:[%s3197_s6] sm:$0x1] }
   0x8   :  { %2567 = vmatprep.subr.mxu1 %v2833_v2 }
  0x81   :  { %v37_v7 = vpop.permute.xlu0 %36 }
  0x82   :  { %vm38_vm3 = vcmp.eq.s32.totalorder %v34_v6, %v37_v7 }
  0x83   :  { %v2446_v8 = vsel %vm38_vm3, 1.0, %v2833_v2 }
  0x84   :  { %2545 = vmatmul.mubr.msk.f32.vlgmr.msra.gmra.mrb[0].mxu0 %vm49_vm2, %v2446_v8 }
  0x85   :  { %2554 = vmatprep.mubr.msk.f32.mxu0 %vm2834_vm1, %v2833_v2  ;;  %2553 = vmatpush3.msra.mxu0 %v2932_v26 }
  0x86   :  { %2557 = vmatprep.subr.mxu0 %v2833_v2 }
  0x88   :  { %2555 = vmatmul.mubr.f32.vlgmr.msra.gmra.mrb[2].mxu0 %v2833_v2 }
  0x89   :  { %2558 = vmatpush3.msra.mxu0 %v2937_v27  ;;  %2559 = vmatprep.mubr.msk.f32.mxu0 %vm2834_vm1, %v2833_v2 }
  0x8a   :  { %2577 = vmatprep.subr.mxu0 %v2833_v2 }
  0xd8   :  { %v201_v9 = vpop.f32.mrb[0].mxu1 }
  0xd9   :  { %v2551_v10 = vpop.f32.mrb[1].mxu1 }
 0x157   :  { %v123_v12 = vpop.f32.mrb[0].mxu0 }
 0x158   :  { %v2921_v13 = vadd.f32 %v2447_v11, %v123_v12  ;;  %v2546_v14 = vpop.f32.mrb[1].mxu0 }
 0x15a   :  { %v205_v15 = vadd.f32 %v201_v9, %v2921_v13 }
 0x15c   :  { %2704 = vtanh.f32 %v205_v15  ;;  %v2450_v17 = vmul.f32 -1.442695, %v205_v15 }
 0x15e   :  { %2706 = vpow2.f32 %v2450_v17 }
 0x166   :  { %v2705_v16 = vpop.eup %2704 }
 0x167   :  { %215 = vrot.lane.b32.xlu0 %v2705_v16, %s2835_s3 }
 0x168   :  { %v2707_v18 = vpop.eup %2706 }
 0x169   :  { %v209_v19 = vadd.f32 1.0, %v2707_v18 }
 0x16b   :  { %2708 = vrcp.f32 %v209_v19 }
 0x175   :  { %v2709_v20 = vpop.eup %2708 }
 0x176   :  { %v213_v23 = vmul.f32 0.0, %v2709_v20 }
 0x1d9   :  { %v216_v21 = vpop.permute.xlu0 %215 }
 0x1da   :  { %v218_v22 = vmul.f32 %v2709_v20, %v216_v21 }
 0x1dc   :  { %220 = vrot.lane.b32.xlu1 %v218_v22, %s2836_s2 }
 0x24e   :  { %v221_v24 = vpop.permute.xlu1 %220 }
 0x24f   :  { %v2926_v25 = vadd.f32 %v221_v24, %v213_v23 }
 0x251   :  { %2710 = vtanh.f32 %v2926_v25  ;;  %v488_v55 = vrot.slane %v2926_v25, 7 }
 0x25b   :  { %v2711_v28 = vpop.eup %2710 }
 0x25c   :  { %226 = vrot.lane.b32.xlu1 %v2711_v28, %s2837_s5 }
 0x2ce   :  { %v227_v29 = vpop.permute.xlu1 %226 }
 0x2cf   :  { %v229_v30 = vmul.f32 %v2709_v20, %v227_v29 }
 0x2d1   :  { %301 = vrot.lane.b32.xlu0 %v229_v30, %s2838_s4 }
 0x343   :  { %v302_v31 = vpop.permute.xlu0 %301 }
 0x344   :  { %2560 = vmatmul.mubr.msk.f32.vlgmr.msra.gmra.mrb[2].mxu0 %vm131_vm4, %v302_v31  ;;  %2565 = vmatmul.mubr.msk.f32.vlgmr.msra.gmra.mrb[2].mxu1 %vm131_vm4, %v302_v31 }
 0x345   :  { %2568 = vmatpush3.msra.mxu1 %v2932_v26  ;;  %2569 = vmatprep.mubr.msk.f32.mxu1 %vm2834_vm1, %v2833_v2 }
 0x346   :  { %2572 = vmatprep.subr.mxu1 %v2833_v2  ;;  %2578 = vmatpush3.msra.mxu0 %v2902_v4 }
 0x347   :  { %2579 = vmatprep.mubr.msk.f32.mxu0 %vm2834_vm1, %v2833_v2  ;;  %2582 = vmatprep.subr.mxu0 %v2833_v2 }
 0x417   :  { %v371_v33 = vpop.f32.mrb[2].mxu0  ;;  %v472_v34 = vpop.f32.mrb[2].mxu1 }
 0x418   :  { %v2672_v35 = vadd.f32 %v371_v33, %v2961_v32  ;;  %v477_v36 = vrot.slane %v472_v34, 7  ;;  %v2561_v37 = vpop.f32.mrb[3].mxu0  ;;  %v2566_v38 = vpop.f32.mrb[3].mxu1 }
 0x41a   :  { %2712 = vtanh.f32 %v2672_v35  ;;  %v479_v39 = vadd.f32 %v477_v36, %v2921_v13  ;;  %v2452_v42 = vmul.f32 -1.442695, %v2672_v35 }
 0x41c   :  { %2714 = vtanh.f32 %v479_v39  ;;  %v2454_v43 = vmul.f32 -1.442695, %v479_v39 }
 0x41d   :  { %2716 = vpow2.f32 %v2452_v42 }
 0x41e   :  { %2718 = vpow2.f32 %v2454_v43 }
 0x424   :  { %v2713_v40 = vpop.eup %2712 }
 0x425   :  { %385 = vrot.lane.b32.xlu1 %v2713_v40, %s2835_s3 }
 0x426   :  { %v2715_v41 = vpop.eup %2714 }
 0x427   :  { %492 = vrot.lane.b32.xlu0 %v2715_v41, %s2835_s3  ;;  %v2717_v44 = vpop.eup %2716 }
 0x428   :  { %v2719_v45 = vpop.eup %2718  ;;  %v379_v46 = vadd.f32 1.0, %v2717_v44 }
 0x429   :  { %v483_v47 = vadd.f32 1.0, %v2719_v45 }
 0x42a   :  { %2720 = vrcp.f32 %v379_v46 }
 0x42b   :  { %2722 = vrcp.f32 %v483_v47 }
 0x434   :  { %v2721_v48 = vpop.eup %2720 }
 0x435   :  { %v2723_v51 = vpop.eup %2722  ;;  %v383_v54 = vmul.f32 0.0, %v2721_v48 }
 0x436   :  { %v490_v58 = vmul.f32 %v2723_v51, %v488_v55 }
 0x497   :  { %v386_v49 = vpop.permute.xlu1 %385 }
 0x498   :  { %v388_v50 = vmul.f32 %v2721_v48, %v386_v49 }
 0x499   :  { %v493_v52 = vpop.permute.xlu0 %492 }
 0x49a   :  { %390 = vrot.lane.b32.xlu1 %v388_v50, %s2836_s2  ;;  %v495_v53 = vmul.f32 %v2723_v51, %v493_v52 }
 0x49c   :  { %497 = vrot.lane.b32.xlu0 %v495_v53, %s2836_s2 }
 0x50c   :  { %v391_v56 = vpop.permute.xlu1 %390 }
 0x50d   :  { %v2970_v57 = vadd.f32 %v391_v56, %v383_v54 }
 0x50e   :  { %v498_v59 = vpop.permute.xlu0 %497 }
 0x50f   :  { %2724 = vtanh.f32 %v2970_v57  ;;  %v500_v60 = vadd.f32 %v498_v59, %v490_v58 }
 0x511   :  { %2726 = vtanh.f32 %v500_v60  ;;  %v767_v33 = vrot.slane %v500_v60, 7 }
 0x519   :  { %v2725_v61 = vpop.eup %2724 }
 0x51a   :  { %396 = vrot.lane.b32.xlu1 %v2725_v61, %s2837_s5 }
 0x51b   :  { %v2727_v62 = vpop.eup %2726 }
 0x51c   :  { %503 = vrot.lane.b32.xlu0 %v2727_v62, %s2837_s5 }
 0x58c   :  { %v397_v63 = vpop.permute.xlu1 %396 }
 0x58d   :  { %v399_v0 = vmul.f32 %v2721_v48, %v397_v63 }
 0x58e   :  { %v504_v1 = vpop.permute.xlu0 %503 }
 0x58f   :  { %401 = vrot.lane.b32.xlu1 %v399_v0, %s2838_s4  ;;  %v506_v3 = vmul.f32 %v2723_v51, %v504_v1 }
 0x591   :  { %v580_v5 = vrot.slane %v506_v3, 1 }
 0x593   :  { %581 = vrot.lane.b32.xlu0 %v580_v5, %s2838_s4 }
 0x601   :  { %v402_v6 = vpop.permute.xlu1 %401 }
 0x602   :  { %405 = vst.msk [vmem:[#allocation2] sm:$0x1] %vm404_vm5, %v402_v6  ;;  %2570 = vmatmul.mubr.msk.f32.vlgmr.msra.gmra.mrb[4].mxu1 %vm131_vm4, %v402_v6 }
 0x603   :  { %2573 = vmatpush3.msra.mxu1 %v2937_v27  ;;  %2574 = vmatprep.mubr.msk.f32.mxu1 %vm2834_vm1, %v2833_v2 }
 0x604   :  { %2592 = vmatprep.subr.mxu1 %v2833_v2 }
 0x605   :  { %v582_v7 = vpop.permute.xlu0 %581 }
 0x606   :  { %2580 = vmatmul.mubr.msk.f32.vlgmr.msra.gmra.mrb[4].mxu0 %vm131_vm4, %v582_v7 }
 0x607   :  { %2583 = vmatpush3.msra.mxu0 %v2932_v26  ;;  %2584 = vmatprep.mubr.msk.f32.mxu0 %vm2834_vm1, %v2833_v2 }
 0x608   :  { %2587 = vmatprep.subr.mxu0 %v2833_v2 }
 0x60a   :  { %2575 = vmatmul.mubr.msk.f32.vlgmr.msra.gmra.mrb[4].mxu1 %vm131_vm4, %v582_v7 }
 0x60b   :  { %2593 = vmatpush3.msra.mxu1 %v2902_v4  ;;  %2594 = vmatprep.mubr.msk.f32.mxu1 %vm2834_vm1, %v2833_v2 }
 0x60c   :  { %2597 = vmatprep.subr.mxu1 %v2833_v2 }
 0x6d9   :  { %v751_v8 = vpop.f32.mrb[4].mxu0 }
 0x6da   :  { %v756_v9 = vrot.slane %v751_v8, 6  ;;  %v2581_v10 = vpop.f32.mrb[5].mxu0 }
 0x6dc   :  { %v758_v11 = vadd.f32 %v756_v9, %v2921_v13 }
 0x6dd   :  { %v651_v12 = vpop.f32.mrb[4].mxu1 }
 0x6de   :  { %v2673_v14 = vadd.f32 %v651_v12, %v2961_v32  ;;  %v2576_v15 = vpop.f32.mrb[5].mxu1  ;;  %2728 = vtanh.f32 %v758_v11  ;;  %v2459_v18 = vmul.f32 -1.442695, %v758_v11 }
 0x6e0   :  { %2730 = vtanh.f32 %v2673_v14  ;;  %v2457_v19 = vmul.f32 -1.442695, %v2673_v14 }
 0x6e1   :  { %2732 = vpow2.f32 %v2459_v18 }
 0x6e2   :  { %2734 = vpow2.f32 %v2457_v19 }
 0x6e8   :  { %v2729_v16 = vpop.eup %2728 }
 0x6e9   :  { %771 = vrot.lane.b32.xlu0 %v2729_v16, %s2835_s3 }
 0x6ea   :  { %v2731_v17 = vpop.eup %2730 }
 0x6eb   :  { %665 = vrot.lane.b32.xlu1 %v2731_v17, %s2835_s3  ;;  %v2733_v20 = vpop.eup %2732 }
 0x6ec   :  { %v2735_v21 = vpop.eup %2734  ;;  %v762_v22 = vadd.f32 1.0, %v2733_v20 }
 0x6ed   :  { %v659_v23 = vadd.f32 1.0, %v2735_v21 }
 0x6ee   :  { %2736 = vrcp.f32 %v762_v22 }
 0x6ef   :  { %2738 = vrcp.f32 %v659_v23 }
 0x6f8   :  { %v2737_v24 = vpop.eup %2736 }
 0x6f9   :  { %v2739_v28 = vpop.eup %2738  ;;  %v769_v34 = vmul.f32 %v2737_v24, %v767_v33 }
 0x6fa   :  { %v663_v36 = vmul.f32 %v2739_v28, %v2970_v57 }
 0x75b   :  { %v772_v25 = vpop.permute.xlu0 %771 }
 0x75c   :  { %v774_v29 = vmul.f32 %v2737_v24, %v772_v25 }
 0x75d   :  { %v666_v30 = vpop.permute.xlu1 %665 }
 0x75e   :  { %v668_v31 = vmul.f32 %v2739_v28, %v666_v30  ;;  %776 = vrot.lane.b32.xlu0 %v774_v29, %s2836_s2 }
 0x760   :  { %670 = vrot.lane.b32.xlu1 %v668_v31, %s2836_s2 }
 0x7d0   :  { %v777_v35 = vpop.permute.xlu0 %776 }
 0x7d1   :  { %v3000_v37 = vadd.f32 %v777_v35, %v769_v34 }
 0x7d2   :  { %v671_v38 = vpop.permute.xlu1 %670 }
 0x7d3   :  { %v3002_v39 = vadd.f32 %v671_v38, %v663_v36  ;;  %2740 = vtanh.f32 %v3000_v37  ;;  %v1046_v8 = vrot.slane %v3000_v37, 7 }
 0x7d5   :  { %2742 = vtanh.f32 %v3002_v39 }
 0x7dd   :  { %v2741_v40 = vpop.eup %2740 }
 0x7de   :  { %782 = vrot.lane.b32.xlu0 %v2741_v40, %s2837_s5 }
 0x7df   :  { %v2743_v41 = vpop.eup %2742 }
 0x7e0   :  { %676 = vrot.lane.b32.xlu1 %v2743_v41, %s2837_s5 }
 0x850   :  { %v783_v42 = vpop.permute.xlu0 %782 }
 0x851   :  { %v785_v43 = vmul.f32 %v2737_v24, %v783_v42 }
 0x852   :  { %v677_v44 = vpop.permute.xlu1 %676 }
 0x853   :  { %v679_v45 = vmul.f32 %v2739_v28, %v677_v44  ;;  %v859_v46 = vrot.slane %v785_v43, 2 }
 0x855   :  { %681 = vrot.lane.b32.xlu1 %v679_v45, %s2838_s4  ;;  %860 = vrot.lane.b32.xlu0 %v859_v46, %s2838_s4 }
 0x8c7   :  { %v682_v47 = vpop.permute.xlu1 %681  ;;  %v861_v48 = vpop.permute.xlu0 %860 }
 0x8c8   :  { %684 = vst.msk [vmem:[#allocation2 + $0x1] sm:$0x1] %vm404_vm5, %v682_v47  ;;  %2585 = vmatmul.mubr.msk.f32.vlgmr.msra.gmra.mrb[6].mxu0 %vm131_vm4, %v682_v47  ;;  %2595 = vmatmul.mubr.msk.f32.vlgmr.msra.gmra.mrb[6].mxu1 %vm131_vm4, %v861_v48 }
 0x8c9   :  { %2588 = vmatpush3.msra.mxu0 %v2937_v27  ;;  %2589 = vmatprep.mubr.msk.f32.mxu0 %vm2834_vm1, %v2833_v2 }
 0x8ca   :  { %2607 = vmatprep.subr.mxu0 %v2833_v2  ;;  %2598 = vmatpush3.msra.mxu1 %v2932_v26 }
 0x8cb   :  { %2599 = vmatprep.mubr.msk.f32.mxu1 %vm2834_vm1, %v2833_v2  ;;  %2602 = vmatprep.subr.mxu1 %v2833_v2 }
 0x8d0   :  { %2590 = vmatmul.mubr.msk.f32.vlgmr.msra.gmra.mrb[6].mxu0 %vm131_vm4, %v861_v48 }
 0x8d1   :  { %2608 = vmatpush3.msra.mxu0 %v2902_v4  ;;  %2609 = vmatprep.mubr.msk.f32.mxu0 %vm2834_vm1, %v2833_v2 }
 0x8d2   :  { %2612 = vmatprep.subr.mxu0 %v2833_v2 }
 0x99b   :  { %v1030_v49 = vpop.f32.mrb[6].mxu1 }
 0x99c   :  { %v1035_v50 = vrot.slane %v1030_v49, 5  ;;  %v2596_v51 = vpop.f32.mrb[7].mxu1 }
 0x99e   :  { %v1037_v52 = vadd.f32 %v1035_v50, %v2921_v13 }
 0x9a0   :  { %2744 = vtanh.f32 %v1037_v52  ;;  %v2464_v58 = vmul.f32 -1.442695, %v1037_v52 }
 0x9a3   :  { %v930_v53 = vpop.f32.mrb[6].mxu0 }
 0x9a4   :  { %v2674_v54 = vadd.f32 %v930_v53, %v2961_v32  ;;  %v2591_v55 = vpop.f32.mrb[7].mxu0 }
 0x9a6   :  { %2746 = vtanh.f32 %v2674_v54  ;;  %v2462_v59 = vmul.f32 -1.442695, %v2674_v54 }
 0x9a7   :  { %2748 = vpow2.f32 %v2464_v58 }
 0x9a8   :  { %2750 = vpow2.f32 %v2462_v59 }
 0x9aa   :  { %v2745_v56 = vpop.eup %2744 }
 0x9ab   :  { %1050 = vrot.lane.b32.xlu0 %v2745_v56, %s2835_s3 }
 0x9b0   :  { %v2747_v57 = vpop.eup %2746 }
 0x9b1   :  { %944 = vrot.lane.b32.xlu1 %v2747_v57, %s2835_s3  ;;  %v2749_v60 = vpop.eup %2748 }
 0x9b2   :  { %v1041_v61 = vadd.f32 1.0, %v2749_v60  ;;  %v2751_v62 = vpop.eup %2750 }
 0x9b3   :  { %v938_v63 = vadd.f32 1.0, %v2751_v62 }
 0x9b4   :  { %2752 = vrcp.f32 %v1041_v61 }
 0x9b5   :  { %2754 = vrcp.f32 %v938_v63 }
 0x9be   :  { %v2753_v0 = vpop.eup %2752 }
 0x9bf   :  { %v2755_v5 = vpop.eup %2754  ;;  %v1048_v9 = vmul.f32 %v2753_v0, %v1046_v8 }
 0x9c0   :  { %v942_v12 = vmul.f32 %v2755_v5, %v3002_v39 }
 0xa1d   :  { %v1051_v1 = vpop.permute.xlu0 %1050 }
 0xa1e   :  { %v1053_v3 = vmul.f32 %v2753_v0, %v1051_v1 }
 0xa20   :  { %1055 = vrot.lane.b32.xlu0 %v1053_v3, %s2836_s2 }
 0xa23   :  { %v945_v6 = vpop.permute.xlu1 %944 }
 0xa24   :  { %v947_v7 = vmul.f32 %v2755_v5, %v945_v6 }
 0xa26   :  { %949 = vrot.lane.b32.xlu1 %v947_v7, %s2836_s2 }
 0xa92   :  { %v1056_v10 = vpop.permute.xlu0 %1055 }
 0xa93   :  { %v3033_v11 = vadd.f32 %v1056_v10, %v1048_v9 }
 0xa95   :  { %2756 = vtanh.f32 %v3033_v11  ;;  %v1325_v49 = vrot.slane %v3033_v11, 7 }
 0xa98   :  { %v950_v14 = vpop.permute.xlu1 %949 }
 0xa99   :  { %v3037_v15 = vadd.f32 %v950_v14, %v942_v12 }
 0xa9b   :  { %2758 = vtanh.f32 %v3037_v15 }
 0xa9f   :  { %v2757_v16 = vpop.eup %2756 }
 0xaa0   :  { %1061 = vrot.lane.b32.xlu0 %v2757_v16, %s2837_s5 }
 0xaa5   :  { %v2759_v17 = vpop.eup %2758 }
 0xaa6   :  { %955 = vrot.lane.b32.xlu1 %v2759_v17, %s2837_s5 }
 0xb12   :  { %v1062_v18 = vpop.permute.xlu0 %1061 }
 0xb13   :  { %v1064_v19 = vmul.f32 %v2753_v0, %v1062_v18 }
 0xb15   :  { %v1138_v20 = vrot.slane %v1064_v19, 3 }
 0xb17   :  { %1139 = vrot.lane.b32.xlu0 %v1138_v20, %s2838_s4 }
 0xb18   :  { %v956_v21 = vpop.permute.xlu1 %955 }
 0xb19   :  { %v958_v22 = vmul.f32 %v2755_v5, %v956_v21 }
 0xb1b   :  { %960 = vrot.lane.b32.xlu1 %v958_v22, %s2838_s4 }
 0xb89   :  { %v1140_v23 = vpop.permute.xlu0 %1139 }
 0xb8a   :  { %2610 = vmatmul.mubr.msk.f32.vlgmr.msra.gmra.mrb[8].mxu0 %vm131_vm4, %v1140_v23 }
 0xb8b   :  { %2613 = vmatpush3.msra.mxu0 %v2932_v26  ;;  %2614 = vmatprep.mubr.msk.f32.mxu0 %vm2834_vm1, %v2833_v2 }
 0xb8c   :  { %2617 = vmatprep.subr.mxu0 %v2833_v2 }
 0xb8d   :  { %v961_v24 = vpop.permute.xlu1 %960 }
 0xb8e   :  { %963 = vst.msk [vmem:[#allocation2 + $0x2] sm:$0x1] %vm404_vm5, %v961_v24  ;;  %2600 = vmatmul.mubr.msk.f32.vlgmr.msra.gmra.mrb[8].mxu1 %vm131_vm4, %v961_v24 }
 0xb8f   :  { %2603 = vmatpush3.msra.mxu1 %v2937_v27  ;;  %2604 = vmatprep.mubr.msk.f32.mxu1 %vm2834_vm1, %v2833_v2 }
 0xb90   :  { %2622 = vmatprep.subr.mxu1 %v2833_v2 }
 0xb96   :  { %2605 = vmatmul.mubr.msk.f32.vlgmr.msra.gmra.mrb[8].mxu1 %vm131_vm4, %v1140_v23 }
 0xb97   :  { %2623 = vmatpush3.msra.mxu1 %v2902_v4  ;;  %2624 = vmatprep.mubr.msk.f32.mxu1 %vm2834_vm1, %v2833_v2 }
 0xb98   :  { %2627 = vmatprep.subr.mxu1 %v2833_v2 }
 0xc5d   :  { %v1309_v25 = vpop.f32.mrb[8].mxu0 }
 0xc5e   :  { %v1314_v28 = vrot.slane %v1309_v25, 4  ;;  %v2611_v29 = vpop.f32.mrb[9].mxu0 }
 0xc60   :  { %v1316_v30 = vadd.f32 %v1314_v28, %v2921_v13 }
 0xc62   :  { %2760 = vtanh.f32 %v1316_v30  ;;  %v2469_v37 = vmul.f32 -1.442695, %v1316_v30 }
 0xc69   :  { %v1209_v31 = vpop.f32.mrb[8].mxu1 }
 0xc6a   :  { %v2675_v33 = vadd.f32 %v1209_v31, %v2961_v32  ;;  %v2606_v34 = vpop.f32.mrb[9].mxu1 }
 0xc6c   :  { %2762 = vtanh.f32 %v2675_v33  ;;  %v2761_v35 = vpop.eup %2760  ;;  %v2467_v38 = vmul.f32 -1.442695, %v2675_v33 }
 0xc6d   :  { %1329 = vrot.lane.b32.xlu0 %v2761_v35, %s2835_s3  ;;  %2764 = vpow2.f32 %v2469_v37 }
 0xc6e   :  { %2766 = vpow2.f32 %v2467_v38 }
 0xc76   :  { %v2763_v36 = vpop.eup %2762 }
 0xc77   :  { %1223 = vrot.lane.b32.xlu1 %v2763_v36, %s2835_s3  ;;  %v2765_v39 = vpop.eup %2764 }
 0xc78   :  { %v1320_v40 = vadd.f32 1.0, %v2765_v39  ;;  %v2767_v41 = vpop.eup %2766 }
 0xc79   :  { %v1217_v42 = vadd.f32 1.0, %v2767_v41 }
 0xc7a   :  { %2768 = vrcp.f32 %v1320_v40 }
 0xc7b   :  { %2770 = vrcp.f32 %v1217_v42 }
 0xc84   :  { %v2769_v43 = vpop.eup %2768 }
 0xc85   :  { %v2771_v46 = vpop.eup %2770  ;;  %v1327_v50 = vmul.f32 %v2769_v43, %v1325_v49 }
 0xc86   :  { %v1221_v53 = vmul.f32 %v2771_v46, %v3037_v15 }
 0xcdf   :  { %v1330_v44 = vpop.permute.xlu0 %1329 }
 0xce0   :  { %v1332_v45 = vmul.f32 %v2769_v43, %v1330_v44 }
 0xce2   :  { %1334 = vrot.lane.b32.xlu0 %v1332_v45, %s2836_s2 }
 0xce9   :  { %v1224_v47 = vpop.permute.xlu1 %1223 }
 0xcea   :  { %v1226_v48 = vmul.f32 %v2771_v46, %v1224_v47 }
 0xcec   :  { %1228 = vrot.lane.b32.xlu1 %v1226_v48, %s2836_s2 }
 0xd54   :  { %v1335_v51 = vpop.permute.xlu0 %1334 }
 0xd55   :  { %v3067_v52 = vadd.f32 %v1335_v51, %v1327_v50 }
 0xd57   :  { %2772 = vtanh.f32 %v3067_v52  ;;  %v1604_v25 = vrot.slane %v3067_v52, 7 }
 0xd5e   :  { %v1229_v54 = vpop.permute.xlu1 %1228 }
 0xd5f   :  { %v3071_v55 = vadd.f32 %v1229_v54, %v1221_v53 }
 0xd61   :  { %2774 = vtanh.f32 %v3071_v55  ;;  %v2773_v56 = vpop.eup %2772 }
 0xd62   :  { %1340 = vrot.lane.b32.xlu0 %v2773_v56, %s2837_s5 }
 0xd6b   :  { %v2775_v57 = vpop.eup %2774 }
 0xd6c   :  { %1234 = vrot.lane.b32.xlu1 %v2775_v57, %s2837_s5 }
 0xdd4   :  { %v1341_v58 = vpop.permute.xlu0 %1340 }
 0xdd5   :  { %v1343_v59 = vmul.f32 %v2769_v43, %v1341_v58 }
 0xdd7   :  { %v1417_v60 = vrot.slane %v1343_v59, 4 }
 0xdd9   :  { %1418 = vrot.lane.b32.xlu0 %v1417_v60, %s2838_s4 }
 0xdde   :  { %v1235_v61 = vpop.permute.xlu1 %1234 }
 0xddf   :  { %v1237_v62 = vmul.f32 %v2771_v46, %v1235_v61 }
 0xde1   :  { %1239 = vrot.lane.b32.xlu1 %v1237_v62, %s2838_s4 }
 0xe4b   :  { %v1419_v63 = vpop.permute.xlu0 %1418 }
 0xe4c   :  { %2625 = vmatmul.mubr.msk.f32.vlgmr.msra.gmra.mrb[10].mxu1 %vm131_vm4, %v1419_v63 }
 0xe4d   :  { %2628 = vmatpush3.msra.mxu1 %v2932_v26  ;;  %2629 = vmatprep.mubr.msk.f32.mxu1 %vm2834_vm1, %v2833_v2 }
 0xe4e   :  { %2632 = vmatprep.subr.mxu1 %v2833_v2 }
 0xe53   :  { %v1240_v0 = vpop.permute.xlu1 %1239 }
 0xe54   :  { %1242 = vst.msk [vmem:[#allocation2 + $0x3] sm:$0x1] %vm404_vm5, %v1240_v0  ;;  %2615 = vmatmul.mubr.msk.f32.vlgmr.msra.gmra.mrb[10].mxu0 %vm131_vm4, %v1240_v0 }
 0xe55   :  { %2618 = vmatpush3.msra.mxu0 %v2937_v27  ;;  %2619 = vmatprep.mubr.msk.f32.mxu0 %vm2834_vm1, %v2833_v2 }
 0xe56   :  { %2637 = vmatprep.subr.mxu0 %v2833_v2 }
 0xe5c   :  { %2620 = vmatmul.mubr.msk.f32.vlgmr.msra.gmra.mrb[10].mxu0 %vm131_vm4, %v1419_v63 }
 0xe5d   :  { %2638 = vmatpush3.msra.mxu0 %v2902_v4  ;;  %2639 = vmatprep.mubr.msk.f32.mxu0 %vm2834_vm1, %v2833_v2 }
 0xe5e   :  { %2642 = vmatprep.subr.mxu0 %v2833_v2 }
 0xf1f   :  { %v1588_v1 = vpop.f32.mrb[10].mxu1 }
 0xf20   :  { %v1593_v3 = vrot.slane %v1588_v1, 3  ;;  %v2626_v5 = vpop.f32.mrb[11].mxu1 }
 0xf22   :  { %v1595_v6 = vadd.f32 %v1593_v3, %v2921_v13 }
 0xf24   :  { %2776 = vtanh.f32 %v1595_v6  ;;  %v2474_v12 = vmul.f32 -1.442695, %v1595_v6 }
 0xf2e   :  { %v2777_v7 = vpop.eup %2776 }
 0xf2f   :  { %v1488_v8 = vpop.f32.mrb[10].mxu0  ;;  %1608 = vrot.lane.b32.xlu0 %v2777_v7, %s2835_s3 }
 0xf30   :  { %v2676_v9 = vadd.f32 %v1488_v8, %v2961_v32  ;;  %v2621_v10 = vpop.f32.mrb[11].mxu0 }
 0xf32   :  { %2778 = vtanh.f32 %v2676_v9  ;;  %v2472_v14 = vmul.f32 -1.442695, %v2676_v9 }
 0xf33   :  { %2780 = vpow2.f32 %v2474_v12 }
 0xf34   :  { %2782 = vpow2.f32 %v2472_v14 }
 0xf3c   :  { %v2779_v11 = vpop.eup %2778 }
 0xf3d   :  { %1502 = vrot.lane.b32.xlu1 %v2779_v11, %s2835_s3  ;;  %v2781_v15 = vpop.eup %2780 }
 0xf3e   :  { %v1599_v16 = vadd.f32 1.0, %v2781_v15  ;;  %v2783_v17 = vpop.eup %2782 }
 0xf3f   :  { %v1496_v18 = vadd.f32 1.0, %v2783_v17 }
 0xf40   :  { %2784 = vrcp.f32 %v1599_v16 }
 0xf41   :  { %2786 = vrcp.f32 %v1496_v18 }
 0xf4a   :  { %v2785_v19 = vpop.eup %2784 }
 0xf4b   :  { %v2787_v22 = vpop.eup %2786  ;;  %v1606_v28 = vmul.f32 %v2785_v19, %v1604_v25 }
 0xf4c   :  { %v1500_v31 = vmul.f32 %v2787_v22, %v3071_v55 }
 0xfa1   :  { %v1609_v20 = vpop.permute.xlu0 %1608 }
 0xfa2   :  { %v1611_v21 = vmul.f32 %v2785_v19, %v1609_v20 }
 0xfa4   :  { %1613 = vrot.lane.b32.xlu0 %v1611_v21, %s2836_s2 }
 0xfaf   :  { %v1503_v23 = vpop.permute.xlu1 %1502 }
 0xfb0   :  { %v1505_v24 = vmul.f32 %v2787_v22, %v1503_v23 }
 0xfb2   :  { %1507 = vrot.lane.b32.xlu1 %v1505_v24, %s2836_s2 }
0x1016   :  { %v1614_v29 = vpop.permute.xlu0 %1613 }
0x1017   :  { %v3101_v30 = vadd.f32 %v1614_v29, %v1606_v28 }
0x1019   :  { %2788 = vtanh.f32 %v3101_v30  ;;  %v1883_v0 = vrot.slane %v3101_v30, 7 }
0x1023   :  { %v2789_v33 = vpop.eup %2788 }
0x1024   :  { %v1508_v34 = vpop.permute.xlu1 %1507  ;;  %1619 = vrot.lane.b32.xlu0 %v2789_v33, %s2837_s5 }
0x1025   :  { %v3106_v35 = vadd.f32 %v1508_v34, %v1500_v31 }
0x1027   :  { %2790 = vtanh.f32 %v3106_v35 }
0x1031   :  { %v2791_v36 = vpop.eup %2790 }
0x1032   :  { %1513 = vrot.lane.b32.xlu1 %v2791_v36, %s2837_s5 }
0x1096   :  { %v1620_v37 = vpop.permute.xlu0 %1619 }
0x1097   :  { %v1622_v38 = vmul.f32 %v2785_v19, %v1620_v37 }
0x1099   :  { %v1696_v39 = vrot.slane %v1622_v38, 5 }
0x109b   :  { %1697 = vrot.lane.b32.xlu0 %v1696_v39, %s2838_s4 }
0x10a4   :  { %v1514_v40 = vpop.permute.xlu1 %1513 }
0x10a5   :  { %v1516_v41 = vmul.f32 %v2787_v22, %v1514_v40 }
0x10a7   :  { %1518 = vrot.lane.b32.xlu1 %v1516_v41, %s2838_s4 }
0x110d   :  { %v1698_v42 = vpop.permute.xlu0 %1697 }
0x110e   :  { %2640 = vmatmul.mubr.msk.f32.vlgmr.msra.gmra.mrb[12].mxu0 %vm131_vm4, %v1698_v42 }
0x110f   :  { %2643 = vmatpush3.msra.mxu0 %v2932_v26  ;;  %2644 = vmatprep.mubr.msk.f32.mxu0 %vm2834_vm1, %v2833_v2 }
0x1110   :  { %2647 = vmatprep.subr.mxu0 %v2833_v2 }
0x1119   :  { %v1519_v43 = vpop.permute.xlu1 %1518 }
0x111a   :  { %1521 = vst.msk [vmem:[#allocation2 + $0x4] sm:$0x1] %vm404_vm5, %v1519_v43  ;;  %2630 = vmatmul.mubr.msk.f32.vlgmr.msra.gmra.mrb[12].mxu1 %vm131_vm4, %v1519_v43 }
0x111b   :  { %2633 = vmatpush3.msra.mxu1 %v2937_v27  ;;  %2634 = vmatprep.mubr.msk.f32.mxu1 %vm2834_vm1, %v2833_v2 }
0x111c   :  { %2652 = vmatprep.subr.mxu1 %v2833_v2 }
0x1122   :  { %2635 = vmatmul.mubr.msk.f32.vlgmr.msra.gmra.mrb[12].mxu1 %vm131_vm4, %v1698_v42 }
0x1123   :  { %2653 = vmatpush3.msra.mxu1 %v2902_v4  ;;  %2654 = vmatprep.mubr.msk.f32.mxu1 %vm2834_vm1, %v2833_v2 }
0x1124   :  { %2657 = vmatprep.subr.mxu1 %v2833_v2 }
0x11e1   :  { %v1867_v44 = vpop.f32.mrb[12].mxu0 }
0x11e2   :  { %v1872_v45 = vrot.slane %v1867_v44, 2  ;;  %v2641_v46 = vpop.f32.mrb[13].mxu0 }
0x11e4   :  { %v1874_v47 = vadd.f32 %v1872_v45, %v2921_v13 }
0x11e6   :  { %2792 = vtanh.f32 %v1874_v47  ;;  %v2479_v52 = vmul.f32 -1.442695, %v1874_v47 }
0x11f0   :  { %v2793_v48 = vpop.eup %2792 }
0x11f1   :  { %1887 = vrot.lane.b32.xlu0 %v2793_v48, %s2835_s3 }
0x11f5   :  { %v1767_v49 = vpop.f32.mrb[12].mxu1 }
0x11f6   :  { %v2677_v50 = vadd.f32 %v1767_v49, %v2961_v32  ;;  %v2636_v51 = vpop.f32.mrb[13].mxu1 }
0x11f8   :  { %2794 = vtanh.f32 %v2677_v50  ;;  %v2477_v55 = vmul.f32 -1.442695, %v2677_v50 }
0x11f9   :  { %2796 = vpow2.f32 %v2479_v52 }
0x1202   :  { %v2795_v4 = vpop.eup %2794 }
0x1203   :  { %1781 = vrot.lane.b32.xlu1 %v2795_v4, %s2835_s3  ;;  %v2797_v53 = vpop.eup %2796 }
0x1204   :  { %v1878_v54 = vadd.f32 1.0, %v2797_v53 }
0x1206   :  { %2798 = vrcp.f32 %v1878_v54 }
0x1207   :  { %2800 = vpow2.f32 %v2477_v55 }
0x1210   :  { %v2799_v56 = vpop.eup %2798 }
0x1211   :  { %v2801_v57 = vpop.eup %2800  ;;  %v1885_v1 = vmul.f32 %v2799_v56, %v1883_v0 }
0x1212   :  { %v1775_v60 = vadd.f32 1.0, %v2801_v57 }
0x1214   :  { %2802 = vrcp.f32 %v1775_v60 }
0x121e   :  { %v2803_v61 = vpop.eup %2802 }
0x121f   :  { %v1779_v7 = vmul.f32 %v2803_v61, %v3106_v35 }
0x1263   :  { %v1888_v58 = vpop.permute.xlu0 %1887 }
0x1264   :  { %v1890_v59 = vmul.f32 %v2799_v56, %v1888_v58 }
0x1266   :  { %1892 = vrot.lane.b32.xlu0 %v1890_v59, %s2836_s2 }
0x1275   :  { %v1782_v62 = vpop.permute.xlu1 %1781 }
0x1276   :  { %v1784_v63 = vmul.f32 %v2803_v61, %v1782_v62 }
0x1278   :  { %1786 = vrot.lane.b32.xlu1 %v1784_v63, %s2836_s2 }
0x12d8   :  { %v1893_v3 = vpop.permute.xlu0 %1892 }
0x12d9   :  { %v3135_v5 = vadd.f32 %v1893_v3, %v1885_v1 }
0x12db   :  { %2804 = vtanh.f32 %v3135_v5  ;;  %v2162_v41 = vrot.slane %v3135_v5, 7  ;;  %v2360_v5 = vld [vmem:[%s3198_s7] sm:$0xff] }
0x12e5   :  { %v2805_v6 = vpop.eup %2804 }
0x12e6   :  { %1898 = vrot.lane.b32.xlu0 %v2805_v6, %s2837_s5 }
0x12ea   :  { %v1787_v8 = vpop.permute.xlu1 %1786 }
0x12eb   :  { %v1789_v9 = vadd.f32 %v1787_v8, %v1779_v7 }
0x12ed   :  { %2806 = vtanh.f32 %v1789_v9 }
0x12f7   :  { %v2807_v10 = vpop.eup %2806 }
0x12f8   :  { %1792 = vrot.lane.b32.xlu1 %v2807_v10, %s2837_s5  ;;  %v2488_v10 = vld [vmem:[%s3199_s8] ss:$0 sm:$0xff] }
0x1358   :  { %v1899_v11 = vpop.permute.xlu0 %1898 }
0x1359   :  { %v1901_v12 = vmul.f32 %v2799_v56, %v1899_v11 }
0x135b   :  { %v1975_v14 = vrot.slane %v1901_v12, 6 }
0x135d   :  { %1976 = vrot.lane.b32.xlu0 %v1975_v14, %s2838_s4 }
0x136a   :  { %v1793_v15 = vpop.permute.xlu1 %1792 }
0x136b   :  { %v1795_v16 = vmul.f32 %v2803_v61, %v1793_v15 }
0x136d   :  { %1797 = vrot.lane.b32.xlu1 %v1795_v16, %s2838_s4 }
0x13cf   :  { %v1977_v17 = vpop.permute.xlu0 %1976 }
0x13d0   :  { %2655 = vmatmul.mubr.msk.f32.vlgmr.msra.gmra.mrb[14].mxu1 %vm131_vm4, %v1977_v17 }
0x13d1   :  { %2658 = vmatpush3.msra.mxu1 %v2932_v26  ;;  %2659 = vmatprep.mubr.msk.f32.mxu1 %vm2834_vm1, %v2833_v2 }
0x13d2   :  { %2662 = vmatprep.subr.mxu1 %v2833_v2 }
0x13df   :  { %v1798_v18 = vpop.permute.xlu1 %1797 }
0x13e0   :  { %1800 = vst.msk [vmem:[#allocation2 + $0x5] sm:$0x1] %vm404_vm5, %v1798_v18  ;;  %2645 = vmatmul.mubr.msk.f32.vlgmr.msra.gmra.mrb[14].mxu0 %vm131_vm4, %v1798_v18 }
0x13e1   :  { %2648 = vmatpush3.msra.mxu0 %v2937_v27  ;;  %2649 = vmatprep.mubr.msk.f32.mxu0 %vm2834_vm1, %v2833_v2 }
0x13e2   :  { %2667 = vmatprep.subr.mxu0 %v2833_v2 }
0x13e8   :  { %2650 = vmatmul.mubr.msk.f32.vlgmr.msra.gmra.mrb[14].mxu0 %vm131_vm4, %v1977_v17 }
0x13e9   :  { %2669 = vmatprep.mubr.msk.f32.mxu0 %vm2834_vm1, %v2833_v2  ;;  %2668 = vmatpush3.msra.mxu0 %v2360_v5 }
0x14a3   :  { %v2146_v26 = vpop.f32.mrb[14].mxu1 }
0x14a4   :  { %v2151_v19 = vrot.slane %v2146_v26, 1  ;;  %v2656_v20 = vpop.f32.mrb[15].mxu1 }
0x14a6   :  { %v2153_v21 = vadd.f32 %v2151_v19, %v2921_v13 }
0x14a8   :  { %2808 = vtanh.f32 %v2153_v21  ;;  %v2484_v29 = vmul.f32 -1.442695, %v2153_v21 }
0x14b2   :  { %v2809_v22 = vpop.eup %2808 }
0x14b3   :  { %2166 = vrot.lane.b32.xlu0 %v2809_v22, %s2835_s3 }
0x14bb   :  { %v2046_v23 = vpop.f32.mrb[14].mxu0 }
0x14bc   :  { %v2678_v24 = vadd.f32 %v2046_v23, %v2961_v32  ;;  %v2651_v25 = vpop.f32.mrb[15].mxu0 }
0x14be   :  { %2810 = vtanh.f32 %v2678_v24  ;;  %v2482_v33 = vmul.f32 -1.442695, %v2678_v24 }
0x14bf   :  { %2812 = vpow2.f32 %v2484_v29 }
0x14c8   :  { %v2811_v28 = vpop.eup %2810 }
0x14c9   :  { %2060 = vrot.lane.b32.xlu1 %v2811_v28, %s2835_s3  ;;  %v2813_v30 = vpop.eup %2812 }
0x14ca   :  { %v2157_v31 = vadd.f32 1.0, %v2813_v30 }
0x14cc   :  { %2814 = vrcp.f32 %v2157_v31 }
0x14cd   :  { %2816 = vpow2.f32 %v2482_v33 }
0x14d6   :  { %v2815_v13 = vpop.eup %2814 }
0x14d7   :  { %v2817_v36 = vpop.eup %2816  ;;  %v2164_v42 = vmul.f32 %v2815_v13, %v2162_v41 }
0x14d8   :  { %v2054_v37 = vadd.f32 1.0, %v2817_v36 }
0x14da   :  { %2818 = vrcp.f32 %v2054_v37 }
0x14e4   :  { %v2819_v38 = vpop.eup %2818 }
0x14e5   :  { %v2058_v46 = vmul.f32 %v2819_v38, %v1789_v9 }
0x1525   :  { %v2167_v34 = vpop.permute.xlu0 %2166 }
0x1526   :  { %v2169_v35 = vmul.f32 %v2815_v13, %v2167_v34 }
0x1528   :  { %2171 = vrot.lane.b32.xlu0 %v2169_v35, %s2836_s2 }
0x153b   :  { %v2061_v39 = vpop.permute.xlu1 %2060 }
0x153c   :  { %v2063_v40 = vmul.f32 %v2819_v38, %v2061_v39 }
0x153e   :  { %2065 = vrot.lane.b32.xlu1 %v2063_v40, %s2836_s2 }
0x159a   :  { %v2172_v43 = vpop.permute.xlu0 %2171 }
0x159b   :  { %v2174_v44 = vadd.f32 %v2172_v43, %v2164_v42 }
0x159d   :  { %2820 = vtanh.f32 %v2174_v44 }
0x15a7   :  { %v2821_v45 = vpop.eup %2820 }
0x15a8   :  { %2177 = vrot.lane.b32.xlu0 %v2821_v45, %s2837_s5 }
0x15b0   :  { %v2066_v47 = vpop.permute.xlu1 %2065 }
0x15b1   :  { %v2068_v48 = vadd.f32 %v2066_v47, %v2058_v46 }
0x15b3   :  { %2822 = vtanh.f32 %v2068_v48 }
0x15bd   :  { %v2823_v49 = vpop.eup %2822 }
0x15be   :  { %2071 = vrot.lane.b32.xlu1 %v2823_v49, %s2837_s5 }
0x161a   :  { %v2178_v50 = vpop.permute.xlu0 %2177 }
0x161b   :  { %v2180_v51 = vmul.f32 %v2815_v13, %v2178_v50 }
0x161d   :  { %v2254_v4 = vrot.slane %v2180_v51, 7 }
0x161f   :  { %2255 = vrot.lane.b32.xlu0 %v2254_v4, %s2838_s4 }
0x1630   :  { %v2072_v52 = vpop.permute.xlu1 %2071 }
0x1631   :  { %v2074_v53 = vmul.f32 %v2819_v38, %v2072_v52 }
0x1633   :  { %2076 = vrot.lane.b32.xlu1 %v2074_v53, %s2838_s4 }
0x1691   :  { %v2256_v55 = vpop.permute.xlu0 %2255 }
0x16a5   :  { %v2077_v54 = vpop.permute.xlu1 %2076 }
0x16a6   :  { %2079 = vst.msk [vmem:[#allocation2 + $0x6] sm:$0x1] %vm404_vm5, %v2077_v54  ;;  %2660 = vmatmul.mubr.msk.f32.vlgmr.msra.gmra.mrb[16].mxu1 %vm131_vm4, %v2077_v54 }
0x16a7   :  { %2663 = vmatpush3.msra.mxu1 %v2937_v27  ;;  %2664 = vmatprep.mubr.msk.f32.mxu1 %vm2834_vm1, %v2833_v2 }
0x16ae   :  { %2665 = vmatmul.mubr.msk.f32.vlgmr.msra.gmra.mrb[16].mxu1 %vm131_vm4, %v2256_v55 }
0x1781   :  { %v2325_v56 = vpop.f32.mrb[16].mxu1 }
0x1782   :  { %v2679_v57 = vadd.f32 %v2325_v56, %v2961_v32  ;;  %v2666_v58 = vpop.f32.mrb[17].mxu1 }
0x1784   :  { %2824 = vtanh.f32 %v2679_v57  ;;  %v2487_v60 = vmul.f32 -1.442695, %v2679_v57 }
0x1786   :  { %2826 = vpow2.f32 %v2487_v60 }
0x178e   :  { %v2825_v59 = vpop.eup %2824 }
0x178f   :  { %2339 = vrot.lane.b32.xlu1 %v2825_v59, %s2835_s3 }
0x1790   :  { %v2827_v61 = vpop.eup %2826 }
0x1791   :  { %v2333_v62 = vadd.f32 1.0, %v2827_v61 }
0x1793   :  { %2828 = vrcp.f32 %v2333_v62 }
0x179d   :  { %v2829_v27 = vpop.eup %2828 }
0x179e   :  { %v2337_v2 = vmul.f32 %v2829_v27, %v2068_v48 }
0x1801   :  { %v2340_v63 = vpop.permute.xlu1 %2339 }
0x1802   :  { %v2342_v0 = vmul.f32 %v2829_v27, %v2340_v63 }
0x1804   :  { %2344 = vrot.lane.b32.xlu0 %v2342_v0, %s2836_s2 }
0x1876   :  { %v2345_v1 = vpop.permute.xlu0 %2344 }
0x1877   :  { %v2347_v3 = vadd.f32 %v2345_v1, %v2337_v2 }
0x1879   :  { %2830 = vtanh.f32 %v2347_v3 }
0x1883   :  { %v2831_v32 = vpop.eup %2830 }
0x1884   :  { %2350 = vrot.lane.b32.xlu1 %v2831_v32, %s2837_s5 }
0x18f6   :  { %v2351_v6 = vpop.permute.xlu1 %2350 }
0x18f7   :  { %v2353_v7 = vmul.f32 %v2829_v27, %v2351_v6 }
0x18f9   :  { %2355 = vrot.lane.b32.xlu0 %v2353_v7, %s2838_s4 }
0x196b   :  { %v2356_v8 = vpop.permute.xlu0 %2355 }
0x196c   :  { %2358 = vst.msk [vmem:[#allocation2 + $0x7] sm:$0x1] %vm404_vm5, %v2356_v8 }
0x1973   :  { %v2359_v9 = vld [vmem:[#allocation2] sm:$0xff] }
0x1974   :  { %2670 = vmatmul.mubr.msk.f32.vlgmr.msra.gmra.mrb[16].mxu0 %vm131_vm4, %v2359_v9 }
0x1a47   :  { %v2437_v11 = vpop.f32.mrb[16].mxu0 }
0x1a48   :  { %v2438_v12 = vadd.f32 %v2488_v10, %v2437_v11  ;;  %v2671_v14 = vpop.f32.mrb[17].mxu0 }
0x1a4a   :  { %2441 = vst.msk [vmem:[%s3200_s9] sm:$0xff] %vm49_vm2, %v2438_v12 }

</bundles_post_ra>
